<compile_context>
chip_gen: v7x
topology: tpu7x:2x2x1
jax: 0.10.0
libtpu: 0.0.40
codegen_flags: <defaults>
</compile_context>

<pallas_src>
import functools

import jax
import jax.numpy as jnp
from jax.experimental import pallas as pl
from jax.experimental.pallas import tpu as pltpu

EPS = 1e-5        # torch.nn.LayerNorm default
NEG_INF = -1e20   # value used by masked_fill in the reference
VEC_ROWS = 8      # rows of the packed per-layer vector-param slab


def _round_up(x, m):
    return ((x + m - 1) // m) * m


def _layer_norm(x, g, b):
    # PyTorch LayerNorm: population variance, eps inside sqrt.
    mean = jnp.mean(x, axis=-1, keepdims=True)
    var = jnp.mean((x - mean) ** 2, axis=-1, keepdims=True)
    return (x - mean) * jax.lax.rsqrt(var + EPS) * g + b


def fused_forward_kernel(x_ref, wqkv_ref, bqkv_ref, wo_ref, w1_ref, w2_ref,
                         vec_ref, wf_ref, bf_ref, out_ref, x_sc, *,
                         num_heads, dk, dim_model, dim_ff, seq):
    """One (batch, layer) grid step; activations live in x_sc across layers."""
    l = pl.program_id(1)
    num_l = pl.num_programs(1)

    # Load the embedded+position-encoded input into the resident accumulator
    # at the first layer of each batch element.
    @pl.when(l == 0)
    def _init():
        x_sc[...] = x_ref[0]

    x = x_sc[...]                                     # [S, D] f32
    inv_scale = float(dk) ** -0.5                     # constant multiply, no divide

    # Packed per-layer vector params, kept as 2-D [1, W] slices (no squeeze).
    vec = vec_ref[0]                                  # [VEC_ROWS, 128]
    bo  = vec[0:1, :dim_model]
    g1  = vec[1:2, :dim_model]
    b1  = vec[2:3, :dim_model]
    bh  = vec[3:4, :dim_ff]
    b2f = vec[4:5, :dim_model]
    g2  = vec[5:6, :dim_model]
    b2  = vec[6:7, :dim_model]

    # ---- Multi-head attention, fully batched over heads ----------------
    # Q/K/V projection as ONE batched matmul over the 3*H head slots
    # (weights stored head-major: no in-kernel reshape/transpose/lane-slice).
    xb = x.astype(jnp.bfloat16)
    xb_b = jnp.broadcast_to(xb[None], (3 * num_heads, seq, dim_model))
    qkv = jnp.einsum('hsd,hde->hse', xb_b, wqkv_ref[0],
                     preferred_element_type=jnp.float32)          # [3H, S, dk]
    qkv = qkv + bqkv_ref[0]                                       # [3H, 1, dk] bias

    q = qkv[:num_heads]                                           # [H, S, dk]
    k = qkv[num_heads:2 * num_heads]
    v = qkv[2 * num_heads:]

    # scores[h, i, j] = q[h, i] . k[h, j]  (batched, contraction on dk — no k.T)
    scores = jnp.einsum('hqd,hkd->hqk', q, k,
                        preferred_element_type=jnp.float32)       # [H, S, S]

    # Causal mask generated in-kernel (no O(S^2) HBM mask input).
    row = jax.lax.broadcasted_iota(jnp.int32, (seq, seq), 0)
    col = jax.lax.broadcasted_iota(jnp.int32, (seq, seq), 1)
    maskb = jnp.where(col <= row, jnp.float32(0.0), jnp.float32(NEG_INF))

    # Reference order: mask (additive -1e20) first, then scale, then softmax.
    t = (scores + maskb[None]) * inv_scale
    m = jnp.max(t, axis=-1, keepdims=True)
    e = jnp.exp(t - m)
    p = e * pl.reciprocal(jnp.sum(e, axis=-1, keepdims=True), approx=True)

    # context[h, i] = sum_j p[h, i, j] * v[h, j]
    ctx = jnp.einsum('hqk,hkd->hqd', p, v,
                     preferred_element_type=jnp.float32)          # [H, S, dk]

    # Output projection: fold the head concat into the Wo contraction —
    # batched matmul per head followed by a cheap leading-axis sum.
    per_head = jnp.einsum('hqd,hdm->hqm', ctx.astype(jnp.bfloat16), wo_ref[0],
                          preferred_element_type=jnp.float32)     # [H, S, D]
    attn = jnp.sum(per_head, axis=0) + bo                         # [S, D]

    # Residual + LayerNorm (dropout = identity in eval mode).
    y = _layer_norm(x + attn, g1, b1)

    # ---- Feed-forward: Linear -> ReLU -> Linear -------------------------
    h1 = jnp.dot(y.astype(jnp.bfloat16), w1_ref[0],
                 preferred_element_type=jnp.float32) + bh
    h1 = jnp.maximum(h1, 0.0)
    ff = jnp.dot(h1.astype(jnp.bfloat16), w2_ref[0],
                 preferred_element_type=jnp.float32) + b2f

    x_sc[...] = _layer_norm(y + ff, g2, b2)

    # ---- Output head (last layer only): Linear(D, vocab) + softmax ------
    @pl.when(l == num_l - 1)
    def _finalize():
        xf = x_sc[...]
        logits = jnp.dot(xf.astype(jnp.bfloat16), wf_ref[...],
                         preferred_element_type=jnp.float32) + bf_ref[...]
        mm = jnp.max(logits, axis=-1, keepdims=True)
        ee = jnp.exp(logits - mm)
        out_ref[0] = ee * pl.reciprocal(jnp.sum(ee, axis=-1, keepdims=True),
                                        approx=True)


def run_fused_forward(x, wqkv, bqkv, wo, w1, w2, vec, wf_pad, bf_pad):
    batch, seq, dim_model = x.shape
    num_layers, h3, _, dk = wqkv.shape
    num_heads = h3 // 3
    dim_ff = w1.shape[2]
    vocab_pad = wf_pad.shape[1]
    vec_w = vec.shape[2]

    kernel = functools.partial(
        fused_forward_kernel,
        num_heads=num_heads, dk=dk, dim_model=dim_model, dim_ff=dim_ff, seq=seq)

    in_specs = [
        pl.BlockSpec((1, seq, dim_model),      lambda b, l: (b, 0, 0)),        # x
        pl.BlockSpec((1, h3, dim_model, dk),   lambda b, l: (l, 0, 0, 0)),     # wqkv
        pl.BlockSpec((1, h3, 1, dk),           lambda b, l: (l, 0, 0, 0)),     # bqkv
        pl.BlockSpec((1, num_heads, dk, dim_model), lambda b, l: (l, 0, 0, 0)),  # wo
        pl.BlockSpec((1, dim_model, dim_ff),   lambda b, l: (l, 0, 0)),        # w1
        pl.BlockSpec((1, dim_ff, dim_model),   lambda b, l: (l, 0, 0)),        # w2
        pl.BlockSpec((1, VEC_ROWS, vec_w),     lambda b, l: (l, 0, 0)),        # vec
        pl.BlockSpec((dim_model, vocab_pad),   lambda b, l: (0, 0)),           # wf
        pl.BlockSpec((1, vocab_pad),           lambda b, l: (0, 0)),           # bf
    ]
    out_spec = pl.BlockSpec((1, seq, vocab_pad), lambda b, l: (b, 0, 0))

    return pl.pallas_call(
        kernel,
        out_shape=jax.ShapeDtypeStruct((batch, seq, vocab_pad), jnp.float32),
        grid=(batch, num_layers),                 # batch parallel, layers streamed
        in_specs=in_specs,
        out_specs=out_spec,
        scratch_shapes=[pltpu.VMEM((seq, dim_model), jnp.float32)],  # resident acts
        compiler_params=pltpu.CompilerParams(
            dimension_semantics=("parallel", "arbitrary"),
            vmem_limit_bytes=32 * 1024 * 1024),
    )(x, wqkv, bqkv, wo, w1, w2, vec, wf_pad, bf_pad)


@functools.partial(jax.jit, static_argnames=("vocab",))
def chess_transformer_forward(src_ids, embed, pos_enc,
                              wqkv, bqkv, wo, w1, w2, vec, wf_pad, bf_pad,
                              *, vocab):
    # Embedding lookup + positional encoding (plain-JAX glue).
    x = jnp.take(embed, src_ids, axis=0) + pos_enc            # [B, S, D] f32
    out = run_fused_forward(x, wqkv, bqkv, wo, w1, w2, vec, wf_pad, bf_pad)
    return out[..., :vocab]                                   # drop padded vocab


def position_encoding(seq_len, dim_model):
    # Matches the reference exactly: phase = pos / 10000**(dim/dim_model),
    # even dims -> sin, odd dims -> cos.
    pos = jnp.arange(seq_len, dtype=jnp.float32).reshape(1, -1, 1)
    dim = jnp.arange(dim_model, dtype=jnp.float32).reshape(1, 1, -1)
    phase = pos / jnp.power(10000.0, dim / dim_model)
    return jnp.where(dim.astype(jnp.int32) % 2 == 0, jnp.sin(phase), jnp.cos(phase))


def init_params(key, num_layers, num_heads, dim_model, dim_ff, vocab, vocab_pad):
    dk = max(dim_model // num_heads, 1)
    vec_width = _round_up(max(dim_model, dim_ff), 128)   # lane-dense vec slab

    wqkv_l, bqkv_l, wo_l, w1_l, w2_l, vec_l = [], [], [], [], [], []
    for _ in range(num_layers):
        key, *ks = jax.random.split(key, 9)
        # Head-major packed Q/K/V projection weights: [3H, D, dk]
        # (slots 0..H-1 = Q heads, H..2H-1 = K heads, 2H..3H-1 = V heads).
        wqkv = 0.05 * jax.random.normal(ks[0], (3 * num_heads, dim_model, dk),
                                        jnp.float32)
        bqkv = 0.05 * jax.random.normal(ks[1], (3 * num_heads, 1, dk), jnp.float32)
        # Output projection stored as [H, dk, D] so the head concat folds into
        # a batched matmul + sum.
        wo = 0.05 * jax.random.normal(ks[2], (num_heads, dk, dim_model), jnp.float32)
        bo = 0.05 * jax.random.normal(ks[3], (dim_model,), jnp.float32)
        w1 = 0.05 * jax.random.normal(ks[4], (dim_model, dim_ff), jnp.float32)
        b1 = 0.05 * jax.random.normal(ks[5], (dim_ff,), jnp.float32)
        w2 = 0.05 * jax.random.normal(ks[6], (dim_ff, dim_model), jnp.float32)
        b2 = 0.05 * jax.random.normal(ks[7], (dim_model,), jnp.float32)
        ln1_g = jnp.ones((dim_model,), jnp.float32)
        ln1_b = jnp.zeros((dim_model,), jnp.float32)
        ln2_g = jnp.ones((dim_model,), jnp.float32)
        ln2_b = jnp.zeros((dim_model,), jnp.float32)

        # Coalesce the remaining small vector params into one lane-dense slab.
        v = jnp.zeros((VEC_ROWS, vec_width), jnp.float32)
        v = v.at[0, :dim_model].set(bo)
        v = v.at[1, :dim_model].set(ln1_g)
        v = v.at[2, :dim_model].set(ln1_b)
        v = v.at[3, :dim_ff].set(b1)
        v = v.at[4, :dim_model].set(b2)
        v = v.at[5, :dim_model].set(ln2_g)
        v = v.at[6, :dim_model].set(ln2_b)

        wqkv_l.append(wqkv); bqkv_l.append(bqkv); wo_l.append(wo)
        w1_l.append(w1); w2_l.append(w2); vec_l.append(v)

    key, k_emb, k_wf, k_bf = jax.random.split(key, 4)
    # TODO(synk): Word2Vec checkpoint loading / index<->word translation have
    # no Pallas equivalent (host-side lookup tables); synthetic embedding used.
    embed = 0.1 * jax.random.normal(k_emb, (vocab, dim_model), jnp.float32)

    wf = 0.05 * jax.random.normal(k_wf, (dim_model, vocab), jnp.float32)
    bf = 0.05 * jax.random.normal(k_bf, (vocab,), jnp.float32)
    # Pad vocab to a lane-dense multiple of 128; padded logits get a -1e30
    # bias so their softmax probability is exactly 0.
    wf_pad = jnp.zeros((dim_model, vocab_pad), jnp.float32).at[:, :vocab].set(wf)
    bf_pad = jnp.full((1, vocab_pad), -1e30, jnp.float32).at[0, :vocab].set(bf)

    # Matmul weights in bf16 (half the DMA, native MXU path); biases / LN / bf
    # stay f32 and all accumulation is f32.
    params = dict(
        wqkv=jnp.stack(wqkv_l).astype(jnp.bfloat16),
        bqkv=jnp.stack(bqkv_l),
        wo=jnp.stack(wo_l).astype(jnp.bfloat16),
        w1=jnp.stack(w1_l).astype(jnp.bfloat16),
        w2=jnp.stack(w2_l).astype(jnp.bfloat16),
        vec=jnp.stack(vec_l),
        wf_pad=wf_pad.astype(jnp.bfloat16),
        bf_pad=bf_pad,
        embed=embed)
    return params, dk


if __name__ == "__main__":
    # Small, self-consistent shapes.
    B, S = 2, 8
    NUM_LAYERS, NUM_HEADS = 2, 6
    DIM_MODEL, DIM_FF = 48, 64          # dim_q = dim_k = 48 // 6 = 8
    VOCAB = 32                          # synthetic "corpus_length"
    VOCAB_PAD = _round_up(VOCAB, 128)

    key = jax.random.PRNGKey(0)
    k_param, k_ids = jax.random.split(key)
    params, dk = init_params(k_param, NUM_LAYERS, NUM_HEADS, DIM_MODEL, DIM_FF,
                             VOCAB, VOCAB_PAD)

    # Hoisted constant: computed once, not per forward call.
    pos_enc = position_encoding(S, DIM_MODEL)     # [1, S, D]

    src_ids = jax.random.randint(k_ids, (B, S), 0, VOCAB, dtype=jnp.int32)

    out = chess_transformer_forward(
        src_ids, params["embed"], pos_enc,
        params["wqkv"], params["bqkv"], params["wo"], params["w1"], params["w2"],
        params["vec"], params["wf_pad"], params["bf_pad"],
        vocab=VOCAB)
    out = jax.block_until_ready(out)

    assert out.shape == (B, S, VOCAB)
    # Softmax rows should sum to ~1 (approx EUP reciprocal + bf16 weights).
    assert bool(jnp.allclose(jnp.sum(out, axis=-1), 1.0, atol=1e-2))
    assert bool(jnp.all(jnp.isfinite(out)))
    print("KERNEL_OK")
</pallas_src>

<mosaic_0001>
module attributes {stable_mosaic.version = 11 : i64} {
  func.func @fused_forward_kernel(%arg0: i32, %arg1: i32, %arg2: memref<1x8x48xf32, #tpu.memory_space<vmem>>, %arg3: memref<1x18x48x8xbf16, #tpu.memory_space<vmem>>, %arg4: memref<1x18x1x8xf32, #tpu.memory_space<vmem>>, %arg5: memref<1x6x8x48xbf16, #tpu.memory_space<vmem>>, %arg6: memref<1x48x64xbf16, #tpu.memory_space<vmem>>, %arg7: memref<1x64x48xbf16, #tpu.memory_space<vmem>>, %arg8: memref<1x8x128xf32, #tpu.memory_space<vmem>>, %arg9: memref<48x128xbf16, #tpu.memory_space<vmem>>, %arg10: memref<1x128xf32, #tpu.memory_space<vmem>>, %arg11: memref<1x8x128xf32, #tpu.memory_space<vmem>>, %arg12: memref<8x48xf32, #tpu.memory_space<vmem>>) attributes {dimension_semantics = [#tpu.dimension_semantics<parallel>, #tpu.dimension_semantics<arbitrary>], iteration_bounds = array<i64: 2, 2>, scalar_prefetch = 0 : i64, scratch_operands = 1 : i64, tpu.core_type = #tpu.core_type<tc>, window_params = [{transform_indices = @transform_0, window_bounds = array<i64: 1, 8, 48>}, {transform_indices = @transform_1, window_bounds = array<i64: 1, 18, 48, 8>}, {transform_indices = @transform_2, window_bounds = array<i64: 1, 18, 1, 8>}, {transform_indices = @transform_3, window_bounds = array<i64: 1, 6, 8, 48>}, {transform_indices = @transform_4, window_bounds = array<i64: 1, 48, 64>}, {transform_indices = @transform_5, window_bounds = array<i64: 1, 64, 48>}, {transform_indices = @transform_6, window_bounds = array<i64: 1, 8, 128>}, {pipeline_mode = #tpu.pipeline_mode<synchronous>, transform_indices = @transform_7, window_bounds = array<i64: 48, 128>}, {pipeline_mode = #tpu.pipeline_mode<synchronous>, transform_indices = @transform_8, window_bounds = array<i64: 1, 128>}, {transform_indices = @transform_9, window_bounds = array<i64: 1, 8, 128>}]} {
    %c0_i32 = arith.constant 0 : i32
    %0 = arith.cmpi eq, %arg1, %c0_i32 : i32
    %1 = arith.extui %0 : i1 to i32
    %c0_i32_0 = arith.constant 0 : i32
    %2 = arith.cmpi ne, %1, %c0_i32_0 : i32
    scf.if %2 {
      %c0_48 = arith.constant 0 : index
      %c0_49 = arith.constant 0 : index
      %c0_50 = arith.constant 0 : index
      %121 = vector.load %arg2[%c0_48, %c0_49, %c0_50] : memref<1x8x48xf32, #tpu.memory_space<vmem>>, vector<1x8x48xf32>
      %122 = vector.shape_cast %121 : vector<1x8x48xf32> to vector<8x48xf32>
      %c0_51 = arith.constant 0 : index
      %c0_52 = arith.constant 0 : index
      %123 = vector.load %arg12[%c0_51, %c0_52] : memref<8x48xf32, #tpu.memory_space<vmem>>, vector<8x48xf32>
      tpu.vector_store %arg12[%c0_51, %c0_52], %122 {strides = array<i32>} : memref<8x48xf32, #tpu.memory_space<vmem>>, vector<8x48xf32>,
    } else {
    }
    %c0 = arith.constant 0 : index
    %c0_1 = arith.constant 0 : index
    %3 = vector.load %arg12[%c0, %c0_1] : memref<8x48xf32, #tpu.memory_space<vmem>>, vector<8x48xf32>
    %c0_2 = arith.constant 0 : index
    %c0_3 = arith.constant 0 : index
    %c0_4 = arith.constant 0 : index
    %4 = vector.load %arg8[%c0_2, %c0_3, %c0_4] : memref<1x8x128xf32, #tpu.memory_space<vmem>>, vector<1x8x128xf32>
    %5 = vector.shape_cast %4 : vector<1x8x128xf32> to vector<8x128xf32>
    %6 = vector.extract_strided_slice %5 {offsets = [0, 0], sizes = [1, 48], strides = [1, 1]} : vector<8x128xf32> to vector<1x48xf32>
    %7 = vector.extract_strided_slice %5 {offsets = [1, 0], sizes = [1, 48], strides = [1, 1]} : vector<8x128xf32> to vector<1x48xf32>
    %8 = vector.extract_strided_slice %5 {offsets = [2, 0], sizes = [1, 48], strides = [1, 1]} : vector<8x128xf32> to vector<1x48xf32>
    %9 = vector.extract_strided_slice %5 {offsets = [3, 0], sizes = [1, 64], strides = [1, 1]} : vector<8x128xf32> to vector<1x64xf32>
    %10 = vector.extract_strided_slice %5 {offsets = [4, 0], sizes = [1, 48], strides = [1, 1]} : vector<8x128xf32> to vector<1x48xf32>
    %11 = vector.extract_strided_slice %5 {offsets = [5, 0], sizes = [1, 48], strides = [1, 1]} : vector<8x128xf32> to vector<1x48xf32>
    %12 = vector.extract_strided_slice %5 {offsets = [6, 0], sizes = [1, 48], strides = [1, 1]} : vector<8x128xf32> to vector<1x48xf32>
    %13 = arith.truncf %3 : vector<8x48xf32> to vector<8x48xbf16>
    %14 = vector.shape_cast %13 : vector<8x48xbf16> to vector<1x8x48xbf16>
    %15 = vector.shape_cast %14 : vector<1x8x48xbf16> to vector<1x8x48xbf16>
    %16 = vector.broadcast %15 : vector<1x8x48xbf16> to vector<18x8x48xbf16>
    %c0_5 = arith.constant 0 : index
    %c0_6 = arith.constant 0 : index
    %c0_7 = arith.constant 0 : index
    %c0_8 = arith.constant 0 : index
    %17 = vector.load %arg3[%c0_5, %c0_6, %c0_7, %c0_8] : memref<1x18x48x8xbf16, #tpu.memory_space<vmem>>, vector<1x18x48x8xbf16>
    %18 = vector.shape_cast %17 : vector<1x18x48x8xbf16> to vector<18x48x8xbf16>
    "tpu.trace_start"() <{level = 10 : i32, message = "hsd,hde->hse"}> : () -> ()
    %cst = arith.constant dense<0.000000e+00> : vector<18x8x8xf32>
    %19 = tpu.matmul %16, %18, %cst {dimension_numbers = #tpu.dot_dimension_numbers<[2], [1], [1], [2], [0, 0, 0, 1, 1, 2], [0], [0]>} : vector<18x8x48xbf16>, vector<18x48x8xbf16>, vector<18x8x8xf32> -> vector<18x8x8xf32>
    "tpu.trace_stop"() : () -> ()
    %c0_9 = arith.constant 0 : index
    %c0_10 = arith.constant 0 : index
    %c0_11 = arith.constant 0 : index
    %c0_12 = arith.constant 0 : index
    %20 = vector.load %arg4[%c0_9, %c0_10, %c0_11, %c0_12] : memref<1x18x1x8xf32, #tpu.memory_space<vmem>>, vector<1x18x1x8xf32>
    %21 = vector.shape_cast %20 : vector<1x18x1x8xf32> to vector<18x1x8xf32>
    %22 = vector.broadcast %21 : vector<18x1x8xf32> to vector<18x8x8xf32>
    %23 = arith.addf %19, %22 : vector<18x8x8xf32>
    %24 = vector.extract_strided_slice %23 {offsets = [0, 0, 0], sizes = [6, 8, 8], strides = [1, 1, 1]} : vector<18x8x8xf32> to vector<6x8x8xf32>
    %25 = vector.extract_strided_slice %23 {offsets = [6, 0, 0], sizes = [6, 8, 8], strides = [1, 1, 1]} : vector<18x8x8xf32> to vector<6x8x8xf32>
    %26 = vector.extract_strided_slice %23 {offsets = [12, 0, 0], sizes = [6, 8, 8], strides = [1, 1, 1]} : vector<18x8x8xf32> to vector<6x8x8xf32>
    "tpu.trace_start"() <{level = 10 : i32, message = "hqd,hkd->hqk"}> : () -> ()
    %cst_13 = arith.constant dense<0.000000e+00> : vector<6x8x8xf32>
    %27 = tpu.matmul %24, %25, %cst_13 {dimension_numbers = #tpu.dot_dimension_numbers<[2], [2], [1], [1], [0, 0, 0, 1, 1, 1], [0], [0]>} : vector<6x8x8xf32>, vector<6x8x8xf32>, vector<6x8x8xf32> -> vector<6x8x8xf32>
    "tpu.trace_stop"() : () -> ()
    %28 = tpu.iota {dimensions = array<i32: 0>} : vector<8x8xi32>
    %29 = tpu.iota {dimensions = array<i32: 1>} : vector<8x8xi32>
    %30 = arith.cmpi sle, %29, %28 : vector<8x8xi32>
    %cst_14 = arith.constant 0.000000e+00 : f32
    %cst_15 = arith.constant -1.000000e+20 : f32
    %31 = vector.broadcast %cst_14 : f32 to vector<8x8xf32>
    %32 = vector.broadcast %cst_15 : f32 to vector<8x8xf32>
    %33 = arith.select %30, %31, %32 : vector<8x8xi1>, vector<8x8xf32>
    %34 = vector.shape_cast %33 : vector<8x8xf32> to vector<1x8x8xf32>
    %35 = vector.broadcast %34 : vector<1x8x8xf32> to vector<6x8x8xf32>
    %36 = arith.addf %27, %35 : vector<6x8x8xf32>
    %cst_16 = arith.constant 0.353553385 : f32
    %37 = vector.broadcast %cst_16 : f32 to vector<6x8x8xf32>
    %38 = arith.mulf %36, %37 : vector<6x8x8xf32>
    %cst_17 = arith.constant dense<0xFF800000> : vector<6x8xf32>
    %39 = vector.multi_reduction <maximumf>, %38, %cst_17 [2] : vector<6x8x8xf32> to vector<6x8xf32>
    %40 = vector.shape_cast %39 : vector<6x8xf32> to vector<6x8x1xf32>
    %41 = vector.broadcast %40 : vector<6x8x1xf32> to vector<6x8x8xf32>
    %42 = arith.subf %38, %41 : vector<6x8x8xf32>
    %43 = math.exp %42 : vector<6x8x8xf32>
    %cst_18 = arith.constant dense<0.000000e+00> : vector<6x8xf32>
    %44 = vector.multi_reduction <add>, %43, %cst_18 [2] : vector<6x8x8xf32> to vector<6x8xf32>
    %45 = vector.shape_cast %44 : vector<6x8xf32> to vector<6x8x1xf32>
    %46 = tpu.reciprocal %45 {approx = true} : vector<6x8x1xf32> -> vector<6x8x1xf32>
    %47 = vector.broadcast %46 : vector<6x8x1xf32> to vector<6x8x8xf32>
    %48 = arith.mulf %43, %47 : vector<6x8x8xf32>
    "tpu.trace_start"() <{level = 10 : i32, message = "hqk,hkd->hqd"}> : () -> ()
    %cst_19 = arith.constant dense<0.000000e+00> : vector<6x8x8xf32>
    %49 = tpu.matmul %48, %26, %cst_19 {dimension_numbers = #tpu.dot_dimension_numbers<[2], [1], [1], [2], [0, 0, 0, 1, 1, 2], [0], [0]>} : vector<6x8x8xf32>, vector<6x8x8xf32>, vector<6x8x8xf32> -> vector<6x8x8xf32>
    "tpu.trace_stop"() : () -> ()
    %50 = arith.truncf %49 : vector<6x8x8xf32> to vector<6x8x8xbf16>
    %c0_20 = arith.constant 0 : index
    %c0_21 = arith.constant 0 : index
    %c0_22 = arith.constant 0 : index
    %c0_23 = arith.constant 0 : index
    %51 = vector.load %arg5[%c0_20, %c0_21, %c0_22, %c0_23] : memref<1x6x8x48xbf16, #tpu.memory_space<vmem>>, vector<1x6x8x48xbf16>
    %52 = vector.shape_cast %51 : vector<1x6x8x48xbf16> to vector<6x8x48xbf16>
    "tpu.trace_start"() <{level = 10 : i32, message = "hqd,hdm->hqm"}> : () -> ()
    %cst_24 = arith.constant dense<0.000000e+00> : vector<6x8x48xf32>
    %53 = tpu.matmul %50, %52, %cst_24 {dimension_numbers = #tpu.dot_dimension_numbers<[2], [1], [1], [2], [0, 0, 0, 1, 1, 2], [0], [0]>} : vector<6x8x8xbf16>, vector<6x8x48xbf16>, vector<6x8x48xf32> -> vector<6x8x48xf32>
    "tpu.trace_stop"() : () -> ()
    %cst_25 = arith.constant dense<0.000000e+00> : vector<8x48xf32>
    %54 = vector.multi_reduction <add>, %53, %cst_25 [0] : vector<6x8x48xf32> to vector<8x48xf32>
    %55 = vector.broadcast %6 : vector<1x48xf32> to vector<8x48xf32>
    %56 = arith.addf %54, %55 : vector<8x48xf32>
    %57 = arith.addf %3, %56 : vector<8x48xf32>
    %cst_26 = arith.constant dense<0.000000e+00> : vector<8xf32>
    %58 = vector.multi_reduction <add>, %57, %cst_26 [1] : vector<8x48xf32> to vector<8xf32>
    %59 = vector.shape_cast %58 : vector<8xf32> to vector<8x1xf32>
    %cst_27 = arith.constant 4.800000e+01 : f32
    %60 = vector.broadcast %cst_27 : f32 to vector<8x1xf32>
    %61 = arith.divf %59, %60 : vector<8x1xf32>
    %62 = vector.broadcast %61 : vector<8x1xf32> to vector<8x48xf32>
    %63 = arith.subf %57, %62 : vector<8x48xf32>
    %64 = arith.mulf %63, %63 : vector<8x48xf32>
    %cst_28 = arith.constant dense<0.000000e+00> : vector<8xf32>
    %65 = vector.multi_reduction <add>, %64, %cst_28 [1] : vector<8x48xf32> to vector<8xf32>
    %66 = vector.shape_cast %65 : vector<8xf32> to vector<8x1xf32>
    %cst_29 = arith.constant 4.800000e+01 : f32
    %67 = vector.broadcast %cst_29 : f32 to vector<8x1xf32>
    %68 = arith.divf %66, %67 : vector<8x1xf32>
    %69 = vector.broadcast %61 : vector<8x1xf32> to vector<8x48xf32>
    %70 = arith.subf %57, %69 : vector<8x48xf32>
    %cst_30 = arith.constant 9.99999974E-6 : f32
    %71 = vector.broadcast %cst_30 : f32 to vector<8x1xf32>
    %72 = arith.addf %68, %71 : vector<8x1xf32>
    %73 = math.rsqrt %72 : vector<8x1xf32>
    %74 = vector.broadcast %73 : vector<8x1xf32> to vector<8x48xf32>
    %75 = arith.mulf %70, %74 : vector<8x48xf32>
    %76 = vector.broadcast %7 : vector<1x48xf32> to vector<8x48xf32>
    %77 = arith.mulf %75, %76 : vector<8x48xf32>
    %78 = vector.broadcast %8 : vector<1x48xf32> to vector<8x48xf32>
    %79 = arith.addf %77, %78 : vector<8x48xf32>
    %80 = arith.truncf %79 : vector<8x48xf32> to vector<8x48xbf16>
    %c0_31 = arith.constant 0 : index
    %c0_32 = arith.constant 0 : index
    %c0_33 = arith.constant 0 : index
    %81 = vector.load %arg6[%c0_31, %c0_32, %c0_33] : memref<1x48x64xbf16, #tpu.memory_space<vmem>>, vector<1x48x64xbf16>
    %82 = vector.shape_cast %81 : vector<1x48x64xbf16> to vector<48x64xbf16>
    %cst_34 = arith.constant dense<0.000000e+00> : vector<8x64xf32>
    %83 = tpu.matmul %80, %82, %cst_34 {dimension_numbers = #tpu.dot_dimension_numbers<[1], [0], [0], [1], [0, 0, 1, 1], [], []>} : vector<8x48xbf16>, vector<48x64xbf16>, vector<8x64xf32> -> vector<8x64xf32>
    %84 = vector.broadcast %9 : vector<1x64xf32> to vector<8x64xf32>
    %85 = arith.addf %83, %84 : vector<8x64xf32>
    %cst_35 = arith.constant 0.000000e+00 : f32
    %86 = vector.broadcast %cst_35 : f32 to vector<8x64xf32>
    %87 = arith.maximumf %85, %86 : vector<8x64xf32>
    %88 = arith.truncf %87 : vector<8x64xf32> to vector<8x64xbf16>
    %c0_36 = arith.constant 0 : index
    %c0_37 = arith.constant 0 : index
    %c0_38 = arith.constant 0 : index
    %89 = vector.load %arg7[%c0_36, %c0_37, %c0_38] : memref<1x64x48xbf16, #tpu.memory_space<vmem>>, vector<1x64x48xbf16>
    %90 = vector.shape_cast %89 : vector<1x64x48xbf16> to vector<64x48xbf16>
    %cst_39 = arith.constant dense<0.000000e+00> : vector<8x48xf32>
    %91 = tpu.matmul %88, %90, %cst_39 {dimension_numbers = #tpu.dot_dimension_numbers<[1], [0], [0], [1], [0, 0, 1, 1], [], []>} : vector<8x64xbf16>, vector<64x48xbf16>, vector<8x48xf32> -> vector<8x48xf32>
    %92 = vector.broadcast %10 : vector<1x48xf32> to vector<8x48xf32>
    %93 = arith.addf %91, %92 : vector<8x48xf32>
    %94 = arith.addf %79, %93 : vector<8x48xf32>
    %cst_40 = arith.constant dense<0.000000e+00> : vector<8xf32>
    %95 = vector.multi_reduction <add>, %94, %cst_40 [1] : vector<8x48xf32> to vector<8xf32>
    %96 = vector.shape_cast %95 : vector<8xf32> to vector<8x1xf32>
    %cst_41 = arith.constant 4.800000e+01 : f32
    %97 = vector.broadcast %cst_41 : f32 to vector<8x1xf32>
    %98 = arith.divf %96, %97 : vector<8x1xf32>
    %99 = vector.broadcast %98 : vector<8x1xf32> to vector<8x48xf32>
    %100 = arith.subf %94, %99 : vector<8x48xf32>
    %101 = arith.mulf %100, %100 : vector<8x48xf32>
    %cst_42 = arith.constant dense<0.000000e+00> : vector<8xf32>
    %102 = vector.multi_reduction <add>, %101, %cst_42 [1] : vector<8x48xf32> to vector<8xf32>
    %103 = vector.shape_cast %102 : vector<8xf32> to vector<8x1xf32>
    %cst_43 = arith.constant 4.800000e+01 : f32
    %104 = vector.broadcast %cst_43 : f32 to vector<8x1xf32>
    %105 = arith.divf %103, %104 : vector<8x1xf32>
    %106 = vector.broadcast %98 : vector<8x1xf32> to vector<8x48xf32>
    %107 = arith.subf %94, %106 : vector<8x48xf32>
    %cst_44 = arith.constant 9.99999974E-6 : f32
    %108 = vector.broadcast %cst_44 : f32 to vector<8x1xf32>
    %109 = arith.addf %105, %108 : vector<8x1xf32>
    %110 = math.rsqrt %109 : vector<8x1xf32>
    %111 = vector.broadcast %110 : vector<8x1xf32> to vector<8x48xf32>
    %112 = arith.mulf %107, %111 : vector<8x48xf32>
    %113 = vector.broadcast %11 : vector<1x48xf32> to vector<8x48xf32>
    %114 = arith.mulf %112, %113 : vector<8x48xf32>
    %115 = vector.broadcast %12 : vector<1x48xf32> to vector<8x48xf32>
    %116 = arith.addf %114, %115 : vector<8x48xf32>
    %c0_45 = arith.constant 0 : index
    %c0_46 = arith.constant 0 : index
    %117 = vector.load %arg12[%c0_45, %c0_46] : memref<8x48xf32, #tpu.memory_space<vmem>>, vector<8x48xf32>
    tpu.vector_store %arg12[%c0_45, %c0_46], %116 {strides = array<i32>} : memref<8x48xf32, #tpu.memory_space<vmem>>, vector<8x48xf32>,
    %c1_i32 = arith.constant 1 : i32
    %118 = arith.cmpi eq, %arg1, %c1_i32 : i32
    %119 = arith.extui %118 : i1 to i32
    %c0_i32_47 = arith.constant 0 : i32
    %120 = arith.cmpi ne, %119, %c0_i32_47 : i32
    scf.if %120 {
      %c0_48 = arith.constant 0 : index
      %c0_49 = arith.constant 0 : index
      %121 = vector.load %arg12[%c0_48, %c0_49] : memref<8x48xf32, #tpu.memory_space<vmem>>, vector<8x48xf32>
      %122 = arith.truncf %121 : vector<8x48xf32> to vector<8x48xbf16>
      %c0_50 = arith.constant 0 : index
      %c0_51 = arith.constant 0 : index
      %123 = vector.load %arg9[%c0_50, %c0_51] : memref<48x128xbf16, #tpu.memory_space<vmem>>, vector<48x128xbf16>
      %cst_52 = arith.constant dense<0.000000e+00> : vector<8x128xf32>
      %124 = tpu.matmul %122, %123, %cst_52 {dimension_numbers = #tpu.dot_dimension_numbers<[1], [0], [0], [1], [0, 0, 1, 1], [], []>} : vector<8x48xbf16>, vector<48x128xbf16>, vector<8x128xf32> -> vector<8x128xf32>
      %c0_53 = arith.constant 0 : index
      %c0_54 = arith.constant 0 : index
      %125 = vector.load %arg10[%c0_53, %c0_54] : memref<1x128xf32, #tpu.memory_space<vmem>>, vector<1x128xf32>
      %126 = vector.broadcast %125 : vector<1x128xf32> to vector<8x128xf32>
      %127 = arith.addf %124, %126 : vector<8x128xf32>
      %cst_55 = arith.constant dense<0xFF800000> : vector<8xf32>
      %128 = vector.multi_reduction <maximumf>, %127, %cst_55 [1] : vector<8x128xf32> to vector<8xf32>
      %129 = vector.shape_cast %128 : vector<8xf32> to vector<8x1xf32>
      %130 = vector.broadcast %129 : vector<8x1xf32> to vector<8x128xf32>
      %131 = arith.subf %127, %130 : vector<8x128xf32>
      %132 = math.exp %131 : vector<8x128xf32>
      %cst_56 = arith.constant dense<0.000000e+00> : vector<8xf32>
      %133 = vector.multi_reduction <add>, %132, %cst_56 [1] : vector<8x128xf32> to vector<8xf32>
      %134 = vector.shape_cast %133 : vector<8xf32> to vector<8x1xf32>
      %135 = tpu.reciprocal %134 {approx = true} : vector<8x1xf32> -> vector<8x1xf32>
      %136 = vector.broadcast %135 : vector<8x1xf32> to vector<8x128xf32>
      %137 = arith.mulf %132, %136 : vector<8x128xf32>
      %c0_57 = arith.constant 0 : index
      %c0_58 = arith.constant 0 : index
      %c0_59 = arith.constant 0 : index
      %138 = vector.load %arg11[%c0_57, %c0_58, %c0_59] : memref<1x8x128xf32, #tpu.memory_space<vmem>>, vector<1x8x128xf32>
      %139 = vector.shape_cast %138 : vector<1x8x128xf32> to vector<8x128xf32>
      %140 = vector.shape_cast %137 : vector<8x128xf32> to vector<1x8x128xf32>
      tpu.vector_store %arg11[%c0_57, %c0_58, %c0_59], %140 {strides = array<i32>} : memref<1x8x128xf32, #tpu.memory_space<vmem>>, vector<1x8x128xf32>,
    } else {
    }
    return
  }
  func.func @transform_0(%arg0: i32, %arg1: i32) -> (i32, i32, i32) {
    %c0_i32 = arith.constant 0 : i32
    %c0_i32_0 = arith.constant 0 : i32
    %c0_i32_1 = arith.constant 0 : i32
    return %arg0, %c0_i32, %c0_i32_0 : i32, i32, i32
  }
  func.func @transform_1(%arg0: i32, %arg1: i32) -> (i32, i32, i32, i32) {
    %c0_i32 = arith.constant 0 : i32
    %c0_i32_0 = arith.constant 0 : i32
    %c0_i32_1 = arith.constant 0 : i32
    %c0_i32_2 = arith.constant 0 : i32
    return %arg1, %c0_i32, %c0_i32_0, %c0_i32_1 : i32, i32, i32, i32
  }
  func.func @transform_2(%arg0: i32, %arg1: i32) -> (i32, i32, i32, i32) {
    %c0_i32 = arith.constant 0 : i32
    %c0_i32_0 = arith.constant 0 : i32
    %c0_i32_1 = arith.constant 0 : i32
    %c0_i32_2 = arith.constant 0 : i32
    return %arg1, %c0_i32, %c0_i32_0, %c0_i32_1 : i32, i32, i32, i32
  }
  func.func @transform_3(%arg0: i32, %arg1: i32) -> (i32, i32, i32, i32) {
    %c0_i32 = arith.constant 0 : i32
    %c0_i32_0 = arith.constant 0 : i32
    %c0_i32_1 = arith.constant 0 : i32
    %c0_i32_2 = arith.constant 0 : i32
    return %arg1, %c0_i32, %c0_i32_0, %c0_i32_1 : i32, i32, i32, i32
  }
  func.func @transform_4(%arg0: i32, %arg1: i32) -> (i32, i32, i32) {
    %c0_i32 = arith.constant 0 : i32
    %c0_i32_0 = arith.constant 0 : i32
    %c0_i32_1 = arith.constant 0 : i32
    return %arg1, %c0_i32, %c0_i32_0 : i32, i32, i32
  }
  func.func @transform_5(%arg0: i32, %arg1: i32) -> (i32, i32, i32) {
    %c0_i32 = arith.constant 0 : i32
    %c0_i32_0 = arith.constant 0 : i32
    %c0_i32_1 = arith.constant 0 : i32
    return %arg1, %c0_i32, %c0_i32_0 : i32, i32, i32
  }
  func.func @transform_6(%arg0: i32, %arg1: i32) -> (i32, i32, i32) {
    %c0_i32 = arith.constant 0 : i32
    %c0_i32_0 = arith.constant 0 : i32
    %c0_i32_1 = arith.constant 0 : i32
    return %arg1, %c0_i32, %c0_i32_0 : i32, i32, i32
  }
  func.func @transform_7(%arg0: i32, %arg1: i32) -> (i32, i32) {
    %c0_i32 = arith.constant 0 : i32
    %c0_i32_0 = arith.constant 0 : i32
    %c0_i32_1 = arith.constant 0 : i32
    return %c0_i32, %c0_i32_0 : i32, i32
  }
  func.func @transform_8(%arg0: i32, %arg1: i32) -> (i32, i32) {
    %c0_i32 = arith.constant 0 : i32
    %c0_i32_0 = arith.constant 0 : i32
    %c0_i32_1 = arith.constant 0 : i32
    return %c0_i32, %c0_i32_0 : i32, i32
  }
  func.func @transform_9(%arg0: i32, %arg1: i32) -> (i32, i32, i32) {
    %c0_i32 = arith.constant 0 : i32
    %c0_i32_0 = arith.constant 0 : i32
    %c0_i32_1 = arith.constant 0 : i32
    return %arg0, %c0_i32, %c0_i32_0 : i32, i32, i32
  }
}

</mosaic_0001>

<bundles_post_ra>
// kernel: chess_transformer_forward.1
= control target key start
LH: loop header
LB: loop body
LE: loop exit
PB: predicated region body
PF: predicated region fallthrough
CT: control target
= control target key end

     0   :  { %s4934_s0 = inlined_call_operand.vmem [shape: f32[2,8,48], index: 0, kind: input, shape index: {}]   ;;  %s4935_s1 = inlined_call_operand.vmem [shape: bf16[2,18,48,8], index: 1, kind: input, shape index: {}]   ;;  %s4936_s2 = inlined_call_operand.vmem [shape: f32[2,18,1,8], index: 2, kind: input, shape index: {}]   ;;  %s4937_s3 = inlined_call_operand.vmem [shape: bf16[2,6,8,48], index: 3, kind: input, shape index: {}]   ;;  %s4938_s4 = inlined_call_operand.vmem [shape: bf16[2,48,64], index: 4, kind: input, shape index: {}]   ;;  %s4939_s5 = inlined_call_operand.vmem [shape: bf16[2,64,48], index: 5, kind: input, shape index: {}]   ;;  %s4940_s6 = inlined_call_operand.vmem [shape: f32[2,8,128], index: 6, kind: input, shape index: {}]   ;;  %s4941_s7 = inlined_call_operand.vmem [shape: bf16[48,128], index: 7, kind: input, shape index: {}]   ;;  %s4942_s8 = inlined_call_operand.vmem [shape: f32[1,128], index: 8, kind: input, shape index: {}]   ;;  %s4943_s9 = inlined_call_operand.hbm [shape: f32[2,8,128], index: 9, kind: output, shape index: {}]  }
   0x1   :  { %4956 = sst [smem:[#allocation16_spill]] %s4934_s0 }
   0x2   :  { %4957 = sst [smem:[#allocation17_spill]] %s4935_s1 }
   0x3   :  { %4958 = sst [smem:[#allocation18_spill]] %s4943_s9 }
   0x4   :  { %14 = vsyncpa [#allocation4], 0 }
   0x5   :  { %16 = vsyncpa [#allocation4 + $0x1], 0  ;;  %s4380_s30 = smov 0   ;;  %s4382_s10 = smov 0  }
   0x6   :  { %s4384_s11 = smov 0   ;;  %s4386_s12 = smov 0  }
   0x7   :  { %s4388_s13 = smov 0   ;;  %s4390_s14 = smov 0  }
   0x8   :  { %s4392_s15 = smov 0   ;;  %s4394_s16 = smov 0  }
   0x9 LB: > { %4959 = sst [smem:[#allocation6_spill]] %s4294_s30  ;;  %s3475_s17 = sadd.s32 4294967295, %s4322_s16   ;;  %s4322_s16 = sphi %s4394_s16, %s22_s16   ;;  %s4318_s15 = sphi %s4392_s15, %s4984_s15   ;;  %s4314_s14 = sphi %s4390_s14, %s4983_s14   ;;  %s4310_s13 = sphi %s4388_s13, %s4982_s13   ;;  %s4306_s12 = sphi %s4386_s12, %s4981_s12   ;;  %s4302_s11 = sphi %s4384_s11, %s4980_s11   ;;  %s4298_s10 = sphi %s4382_s10, %s4986_s10   ;;  %s4294_s30 = sphi %s4380_s30, %s4985_s30  }
   0xa   : > { %4960 = sst [smem:[#allocation7_spill]] %s4302_s11  ;;  %s3476_s18 = sadd.s32 4294967294, %s4322_s16  }
   0xb   : > { %4961 = sst [smem:[#allocation8_spill]] %s4314_s14  ;;  %s31_s19 = sadd.s32 1, %s4314_s14 }
   0xc   : > { %4962 = sst [smem:[#allocation9_spill]] %s4318_s15  ;;  %p32_p0 = scmp.ge.s32.totalorder %s31_s19, 2 }
   0xd   : > { %4963 = sst [smem:[#allocation10_spill]] %s4322_s16  ;;  %s34_s20 = sadd.s32 1, %s4318_s15 }
   0xe   : > { %p275_p1 = scmp.ne.s32.totalorder %s4302_s11, %s4298_s10  ;;  %p276_p2 = scmp.eq.s32.totalorder %s3475_s17, 3 }
   0xf   : > { %s4988_s19 = smov (%p32_p0, %s31_s19), 0  ;;  %s4990_s20 = smov (!%p32_p0, %s34_s20), %s4318_s15 }
  0x10   : > { %4964 = sst [smem:[#allocation11_spill]] %s4988_s19  ;;  %p4429_p3 = por %p276_p2, %p275_p1 }
  0x11   : > { %p281_p4 = scmp.ne.s32.totalorder %s4298_s10, %s4294_s30  ;;  %p36_p5 = scmp.ge.s32.totalorder %s4990_s20, 2 }
  0x12   : > { %s4965_s21 = scalar_select %p4429_p3, 1, 0 }
  0x13   : > { %p282_p6 = scmp.eq.s32.totalorder %s3476_s18, 3  ;;  %p3479_p7 = scmp.ge.s32.totalorder %s4322_s16, 1 }
  0x14   : > { %4966 = sst [smem:[#allocation12_spill]] %s4965_s21  ;;  %p359_p8 = scmp.lt.s32.totalorder %s4322_s16, 5 }
  0x15   : > { %s4992_s20 = smov (%p36_p5, %s4990_s20), 0  ;;  %p4439_p9 = por %p282_p6, %p281_p4 }
  0x16   : > { %4967 = sst [smem:[#allocation13_spill]] %s4992_s20  ;;  %p360_p10 = pnand %p3479_p7, %p359_p8 }
  0x17   : > { %s4968_s22 = scalar_select %p4439_p9, 1, 0 }
  0x18   : > { %s262_s23 = ssub.s32 %s4318_s15, %s4992_s20  ;;  %s265_s24 = sadd.s32 1, %s4302_s11 }
  0x19   : > { %4969 = sst [smem:[#allocation14_spill]] %s4968_s22  ;;  %p263_p11 = scmp.eq.s32.totalorder %s262_s23, 0 }
  0x1a   : > { %363 = sbr.rel (%p360_p10) target bundleno = 2928 (0xb70), region = 56  ;;  %s4949_s26 = sand.u32 (!%p360_p10), 1, %s4298_s10  }
  0x1b   : > { %s4447_s25 = scalar_select %p263_p11, %s4302_s11, %s265_s24  }
  0x1c   : > { %p422_p12 = scmp.lt.s32.totalorder (!%p360_p10), %s4310_s13, 1  ;;  %s4453_s27 = sshll.u32 (!%p360_p10), %s4949_s26, 3 }
  0x1d   : > { %4970 = sst [smem:[#allocation15_spill]] %s4447_s25  ;;  %p426_p13 = scmp.lt.s32.totalorder (!%p360_p10), %s4306_s12, 1 }
  0x1e   : > { %s4971_s0 = sld [smem:[#allocation16_spill]] (!%p360_p10)  ;;  %s4972_s1 = sld [smem:[#allocation17_spill]] (!%p360_p10) }
  0x1f   : > { %s421_s26 = scalar_lea.vmem (!%p360_p10), [#allocation3], %s4453_s27  ;;  %p3488_p0 = scmp.ne.s32.totalorder (!%p360_p10), %s4306_s12, 0 }
  0x21   : > { %s423_s28 = scalar_select %p422_p12, %s4310_s13, 1 }
  0x22   : > { %s427_s29 = scalar_select %p426_p13, %s4306_s12, 1 }
  0x23   : > { %s3481_s17 = sshll.u32 %s423_s28, 3  ;;  %vm460_vm0 = vcmask (!%p3488_p0), 392192  }
  0x24   : > { %s425_s24 = scalar_lea.vmem %s4971_s0, %s3481_s17  ;;  %s4052_s20 = smul.u32 432, %s427_s29 }
  0x25   : > { %s4053_s19 = smul.u32 18, %s427_s29  ;;  %s3622_s15 = sshll.u32 %s427_s29, 5  ;;  %v459_v0 = vld [vmem:[%s425_s24] sm:$0xff] (!%p3488_p0) }
  0x26   : > { %s4464_s11 = scalar_lea.vmem %s4972_s1, %s4052_s20  ;;  %s4054_s22 = smul.u32 24, %s427_s29  ;;  %461 = vst.msk [vmem:[#allocation2] sm:$0xff] (!%p3488_p0), %vm460_vm0, %v459_v0 }
  0x27   : > { %s4469_s16 = scalar_lea.vmem %s4936_s2, %s4053_s19  ;;  %s4474_s21 = scalar_lea.vmem %s4939_s5, %s3622_s15 }
  0x28   : > { %s4479_s23 = scalar_lea.vmem %s4937_s3, %s4054_s22  ;;  %s4484_s20 = scalar_lea.vmem %s4938_s4, %s4054_s22 }
  0x29   : > { %s3487_s25 = sshll.u32 %s427_s29, 3  ;;  %458 = sbr.rel (%p3488_p0) target bundleno = 48 (0x30), region = 60 }
  0x2a   : > { %s4489_s19 = scalar_lea.vmem %s4940_s6, %s3487_s25 }
  0x30 PF: > { %v4131_v1 = vld [vmem:[%s4464_s11] sm:$0xff]   ;;  %v4324_v2 = vmov 0.0   ;;  %v4132_v3 = vld [vmem:[%s4464_s11 + $0x18] sm:$0xff]   ;;  %v4133_v4 = vld [vmem:[%s4464_s11 + $0x8] sm:$0xff]   ;;  %vm4325_vm1 = vmmov 0   ;;  %vm717_vm2 = vcmask 392192  }
  0x31   : > { %3744 = vmatprep.subr.bf16.mxu0 %v4324_v2  ;;  %3754 = vmatprep.subr.bf16.mxu1 %v4324_v2  ;;  %v4134_v5 = vld [vmem:[%s4464_s11 + $0x20] sm:$0xff]   ;;  %v4135_v6 = vld [vmem:[%s4464_s11 + $0x10] sm:$0xff]   ;;  %v4136_v8 = vld [vmem:[%s4464_s11 + $0x28] sm:$0xff]   ;;  %vm1753_vm3 = vcmask 64512   ;;  %vm2735_vm5 = vcmask 1043456   ;;  %vm3160_vm6 = vcmask 523264  }
  0x32   : > { %3745 = vmatpush3.bf16.msra.mxu0 %v4131_v1  ;;  %3750 = vmatprep.mubr.msk.bf16.mxu0 %vm4325_vm1, %v4324_v2  ;;  %v462_v7 = vld [vmem:[#allocation2] sm:$0xff]  ;;  %v4137_v10 = vld [vmem:[%s4464_s11 + $0x30] sm:$0xff]   ;;  %v4138_v11 = vld [vmem:[%s4464_s11 + $0x48] sm:$0xff]   ;;  %p3612_p1 = scmp.ne.s32.totalorder %s4306_s12, 1 }
  0x33   : > { %3755 = vmatpush3.bf16.msra.mxu1 %v4132_v3  ;;  %3746 = vmatprep.subr.bf16.mxu0 %v4324_v2  ;;  %v4509_v9 = vpack.c.bf16 %v462_v7, %v462_v7  ;;  %v4139_v12 = vld [vmem:[%s4464_s11 + $0x38] sm:$0xff]   ;;  %v4140_v13 = vld [vmem:[%s4464_s11 + $0x50] sm:$0xff]   ;;  %v4141_v14 = vld [vmem:[%s4464_s11 + $0x40] sm:$0xff]   ;;  %vm4328_vm7 = vmmov (!%p3612_p1), 0  }
  0x34   : > { %3756 = vmatprep.subr.bf16.mxu1 %v4324_v2  ;;  %3760 = vmatprep.mubr.msk.bf16.mxu1 %vm4325_vm1, %v4324_v2  ;;  %v4142_v15 = vld [vmem:[%s4464_s11 + $0x58] sm:$0xff]   ;;  %v4143_v16 = vld [vmem:[%s4464_s11 + $0x60] sm:$0xff]   ;;  %v4145_v18 = vld [vmem:[%s4464_s11 + $0x68] sm:$0xff]  }
  0x35   : > { %v4144_v17 = vld [vmem:[%s4464_s11 + $0x78] sm:$0xff]   ;;  %v4146_v19 = vld [vmem:[%s4464_s11 + $0x80] sm:$0xff]   ;;  %v4147_v20 = vld [vmem:[%s4464_s11 + $0x70] sm:$0xff]  }
  0x36   : > { %3747 = vmatpush3.bf16.msra.mxu0 %v4133_v4  ;;  %v4148_v21 = vld [vmem:[%s4464_s11 + $0x88] sm:$0xff]   ;;  %v4149_v22 = vld [vmem:[%s4464_s11 + $0x90] sm:$0xff]   ;;  %v4151_v24 = vld [vmem:[%s4464_s11 + $0x98] sm:$0xff]  }
  0x37   : > { %3757 = vmatpush3.bf16.msra.mxu1 %v4134_v5  ;;  %3748 = vmatprep.subr.bf16.mxu0 %v4324_v2  ;;  %v4150_v23 = vld [vmem:[%s4464_s11 + $0xa8] sm:$0xff]   ;;  %v4152_v25 = vld [vmem:[%s4464_s11 + $0xb0] sm:$0xff]   ;;  %v4153_v26 = vld [vmem:[%s4464_s11 + $0xa0] sm:$0xff]  }
  0x38   : > { %3758 = vmatprep.subr.bf16.mxu1 %v4324_v2  ;;  %v4154_v27 = vld [vmem:[%s4464_s11 + $0xb8] sm:$0xff]   ;;  %v4155_v28 = vld [vmem:[%s4464_s11 + $0xc0] sm:$0xff]   ;;  %v4157_v30 = vld [vmem:[%s4464_s11 + $0xc8] sm:$0xff]  }
  0x39   : > { %v4156_v29 = vld [vmem:[%s4464_s11 + $0xd8] sm:$0xff]   ;;  %v4158_v31 = vld [vmem:[%s4464_s11 + $0xe0] sm:$0xff]   ;;  %v4159_v32 = vld [vmem:[%s4464_s11 + $0xd0] sm:$0xff]  }
  0x3a   : > { %3749 = vmatpush3.bf16.msra.mxu0 %v4135_v6  ;;  %v4160_v33 = vld [vmem:[%s4464_s11 + $0xe8] sm:$0xff]   ;;  %v4161_v34 = vld [vmem:[%s4464_s11 + $0xf0] sm:$0xff]   ;;  %v4163_v36 = vld [vmem:[%s4464_s11 + $0xf8] sm:$0xff]  }
  0x3b   : > { %3759 = vmatpush3.bf16.msra.mxu1 %v4136_v8  ;;  %3764 = vmatprep.subr.bf16.mxu0 %v4324_v2  ;;  %v4162_v35 = vld [vmem:[%s4464_s11 + $0x108] sm:$0xff]   ;;  %v4164_v37 = vld [vmem:[%s4464_s11 + $0x110] sm:$0xff]   ;;  %v4165_v38 = vld [vmem:[%s4464_s11 + $0x100] sm:$0xff]  }
  0x3c   : > { %3774 = vmatprep.subr.bf16.mxu1 %v4324_v2  ;;  %v4166_v39 = vld [vmem:[%s4464_s11 + $0x118] sm:$0xff]   ;;  %v4167_v40 = vld [vmem:[%s4464_s11 + $0x120] sm:$0xff]   ;;  %v4169_v42 = vld [vmem:[%s4464_s11 + $0x128] sm:$0xff]  }
  0x3d   : > { %3751 = vmatmul.mubr.msk.bf16.vlgmr.msra.gmra.mrb[0].mxu0 %vm717_vm2, %v4509_v9  ;;  %v4168_v41 = vld [vmem:[%s4464_s11 + $0x138] sm:$0xff]   ;;  %v4170_v43 = vld [vmem:[%s4464_s11 + $0x140] sm:$0xff]   ;;  %v4171_v44 = vld [vmem:[%s4464_s11 + $0x130] sm:$0xff]  }
  0x3e   : > { %3761 = vmatmul.mubr.msk.bf16.vlgmr.msra.gmra.mrb[0].mxu1 %vm717_vm2, %v4509_v9  ;;  %3765 = vmatpush3.bf16.msra.mxu0 %v4137_v10  ;;  %v4172_v45 = vld [vmem:[%s4464_s11 + $0x148] sm:$0xff]   ;;  %v4173_v46 = vld [vmem:[%s4464_s11 + $0x150] sm:$0xff]   ;;  %v4175_v48 = vld [vmem:[%s4464_s11 + $0x158] sm:$0xff]  }
  0x3f   : > { %3775 = vmatpush3.bf16.msra.mxu1 %v4138_v11  ;;  %3766 = vmatprep.subr.bf16.mxu0 %v4324_v2  ;;  %v4174_v47 = vld [vmem:[%s4464_s11 + $0x168] sm:$0xff]   ;;  %v4176_v49 = vld [vmem:[%s4464_s11 + $0x170] sm:$0xff]   ;;  %v4177_v50 = vld [vmem:[%s4464_s11 + $0x160] sm:$0xff]  }
  0x40   : > { %3776 = vmatprep.subr.bf16.mxu1 %v4324_v2  ;;  %3770 = vmatprep.mubr.msk.bf16.mxu0 %vm4325_vm1, %v4324_v2  ;;  %v4178_v51 = vld [vmem:[%s4464_s11 + $0x178] sm:$0xff]   ;;  %v4179_v52 = vld [vmem:[%s4464_s11 + $0x180] sm:$0xff]   ;;  %v4181_v54 = vld [vmem:[%s4464_s11 + $0x188] sm:$0xff]  }
  0x41   : > { %3780 = vmatprep.mubr.msk.bf16.mxu1 %vm4325_vm1, %v4324_v2  ;;  %v4180_v53 = vld [vmem:[%s4464_s11 + $0x198] sm:$0xff]   ;;  %v4182_v55 = vld [vmem:[%s4464_s11 + $0x1a0] sm:$0xff]   ;;  %v4183_v56 = vld [vmem:[%s4464_s11 + $0x190] sm:$0xff]  }
  0x42   : > { %3767 = vmatpush3.bf16.msra.mxu0 %v4139_v12  ;;  %v4184_v57 = vld [vmem:[%s4464_s11 + $0x1a8] sm:$0xff]  }
  0x43   : > { %3777 = vmatpush3.bf16.msra.mxu1 %v4140_v13  ;;  %3768 = vmatprep.subr.bf16.mxu0 %v4324_v2 }
  0x44   : > { %3778 = vmatprep.subr.bf16.mxu1 %v4324_v2 }
  0x46   : > { %3769 = vmatpush3.bf16.msra.mxu0 %v4141_v14 }
  0x47   : > { %3779 = vmatpush3.bf16.msra.mxu1 %v4142_v15  ;;  %3784 = vmatprep.subr.bf16.mxu0 %v4324_v2 }
  0x48   : > { %3794 = vmatprep.subr.bf16.mxu1 %v4324_v2 }
  0x49   : > { %3771 = vmatmul.mubr.msk.bf16.vlgmr.msra.gmra.mrb[4].mxu0 %vm717_vm2, %v4509_v9 }
  0x4a   : > { %3781 = vmatmul.mubr.msk.bf16.vlgmr.msra.gmra.mrb[4].mxu1 %vm717_vm2, %v4509_v9  ;;  %3785 = vmatpush3.bf16.msra.mxu0 %v4143_v16 }
  0x4b   : > { %3795 = vmatpush3.bf16.msra.mxu1 %v4144_v17  ;;  %3786 = vmatprep.subr.bf16.mxu0 %v4324_v2 }
  0x4c   : > { %3796 = vmatprep.subr.bf16.mxu1 %v4324_v2  ;;  %3790 = vmatprep.mubr.msk.bf16.mxu0 %vm4325_vm1, %v4324_v2 }
  0x4d   : > { %3800 = vmatprep.mubr.msk.bf16.mxu1 %vm4325_vm1, %v4324_v2 }
  0x4e   : > { %3787 = vmatpush3.bf16.msra.mxu0 %v4145_v18 }
  0x4f   : > { %3797 = vmatpush3.bf16.msra.mxu1 %v4146_v19  ;;  %3788 = vmatprep.subr.bf16.mxu0 %v4324_v2  ;;  %v3495_v19 = vld [vmem:[%s4469_s16 + $0x6] ss:$0 sm:$0xff] }
  0x50   : > { %3798 = vmatprep.subr.bf16.mxu1 %v4324_v2 }
  0x52   : > { %3789 = vmatpush3.bf16.msra.mxu0 %v4147_v20  ;;  %v3496_v20 = vld [vmem:[%s4469_s16 + $0x7] ss:$0 sm:$0xff] }
  0x53   : > { %3799 = vmatpush3.bf16.msra.mxu1 %v4148_v21  ;;  %3804 = vmatprep.subr.bf16.mxu0 %v4324_v2 }
  0x54   : > { %3814 = vmatprep.subr.bf16.mxu1 %v4324_v2 }
  0x55   : > { %3791 = vmatmul.mubr.msk.bf16.vlgmr.msra.gmra.mrb[8].mxu0 %vm717_vm2, %v4509_v9 }
  0x56   : > { %3801 = vmatmul.mubr.msk.bf16.vlgmr.msra.gmra.mrb[8].mxu1 %vm717_vm2, %v4509_v9  ;;  %3805 = vmatpush3.bf16.msra.mxu0 %v4149_v22  ;;  %v3489_v22 = vld [vmem:[%s4469_s16] ss:$0 sm:$0xff] }
  0x57   : > { %3815 = vmatpush3.bf16.msra.mxu1 %v4150_v23  ;;  %3806 = vmatprep.subr.bf16.mxu0 %v4324_v2 }
  0x58   : > { %3816 = vmatprep.subr.bf16.mxu1 %v4324_v2  ;;  %3810 = vmatprep.mubr.msk.bf16.mxu0 %vm4325_vm1, %v4324_v2 }
  0x59   : > { %3820 = vmatprep.mubr.msk.bf16.mxu1 %vm4325_vm1, %v4324_v2 }
  0x5a   : > { %3807 = vmatpush3.bf16.msra.mxu0 %v4151_v24 }
  0x5b   : > { %3817 = vmatpush3.bf16.msra.mxu1 %v4152_v25  ;;  %3808 = vmatprep.subr.bf16.mxu0 %v4324_v2 }
  0x5c   : > { %3818 = vmatprep.subr.bf16.mxu1 %v4324_v2 }
  0x5e   : > { %3809 = vmatpush3.bf16.msra.mxu0 %v4153_v26  ;;  %v3490_v26 = vld [vmem:[%s4469_s16 + $0x1] ss:$0 sm:$0xff] }
  0x5f   : > { %3819 = vmatpush3.bf16.msra.mxu1 %v4154_v27  ;;  %3824 = vmatprep.subr.bf16.mxu0 %v4324_v2 }
  0x60   : > { %3834 = vmatprep.subr.bf16.mxu1 %v4324_v2 }
  0x61   : > { %3811 = vmatmul.mubr.msk.bf16.vlgmr.msra.gmra.mrb[12].mxu0 %vm717_vm2, %v4509_v9 }
  0x62   : > { %3821 = vmatmul.mubr.msk.bf16.vlgmr.msra.gmra.mrb[12].mxu1 %vm717_vm2, %v4509_v9  ;;  %3825 = vmatpush3.bf16.msra.mxu0 %v4155_v28 }
  0x63   : > { %3835 = vmatpush3.bf16.msra.mxu1 %v4156_v29  ;;  %3826 = vmatprep.subr.bf16.mxu0 %v4324_v2 }
  0x64   : > { %3836 = vmatprep.subr.bf16.mxu1 %v4324_v2  ;;  %3830 = vmatprep.mubr.msk.bf16.mxu0 %vm4325_vm1, %v4324_v2 }
  0x65   : > { %3840 = vmatprep.mubr.msk.bf16.mxu1 %vm4325_vm1, %v4324_v2 }
  0x66   : > { %3827 = vmatpush3.bf16.msra.mxu0 %v4157_v30 }
  0x67   : > { %3837 = vmatpush3.bf16.msra.mxu1 %v4158_v31  ;;  %3828 = vmatprep.subr.bf16.mxu0 %v4324_v2 }
  0x68   : > { %3838 = vmatprep.subr.bf16.mxu1 %v4324_v2 }
  0x6a   : > { %3829 = vmatpush3.bf16.msra.mxu0 %v4159_v32 }
  0x6b   : > { %3839 = vmatpush3.bf16.msra.mxu1 %v4160_v33  ;;  %3844 = vmatprep.subr.bf16.mxu0 %v4324_v2 }
  0x6c   : > { %3854 = vmatprep.subr.bf16.mxu1 %v4324_v2 }
  0x6d   : > { %3831 = vmatmul.mubr.msk.bf16.vlgmr.msra.gmra.mrb[16].mxu0 %vm717_vm2, %v4509_v9 }
  0x6e   : > { %3841 = vmatmul.mubr.msk.bf16.vlgmr.msra.gmra.mrb[16].mxu1 %vm717_vm2, %v4509_v9  ;;  %3845 = vmatpush3.bf16.msra.mxu0 %v4161_v34 }
  0x6f   : > { %3855 = vmatpush3.bf16.msra.mxu1 %v4162_v35  ;;  %3846 = vmatprep.subr.bf16.mxu0 %v4324_v2  ;;  %v3497_v35 = vld [vmem:[%s4469_s16 + $0x8] ss:$0 sm:$0xff] }
  0x70   : > { %3856 = vmatprep.subr.bf16.mxu1 %v4324_v2  ;;  %3850 = vmatprep.mubr.msk.bf16.mxu0 %vm4325_vm1, %v4324_v2 }
  0x71   : > { %3860 = vmatprep.mubr.msk.bf16.mxu1 %vm4325_vm1, %v4324_v2 }
  0x72   : > { %3847 = vmatpush3.bf16.msra.mxu0 %v4163_v36  ;;  %v3498_v36 = vld [vmem:[%s4469_s16 + $0x9] ss:$0 sm:$0xff] }
  0x73   : > { %3857 = vmatpush3.bf16.msra.mxu1 %v4164_v37  ;;  %3848 = vmatprep.subr.bf16.mxu0 %v4324_v2 }
  0x74   : > { %3858 = vmatprep.subr.bf16.mxu1 %v4324_v2 }
  0x76   : > { %3849 = vmatpush3.bf16.msra.mxu0 %v4165_v38  ;;  %v3491_v38 = vld [vmem:[%s4469_s16 + $0x2] ss:$0 sm:$0xff] }
  0x77   : > { %3859 = vmatpush3.bf16.msra.mxu1 %v4166_v39  ;;  %3864 = vmatprep.subr.bf16.mxu0 %v4324_v2 }
  0x78   : > { %3874 = vmatprep.subr.bf16.mxu1 %v4324_v2 }
  0x79   : > { %3851 = vmatmul.mubr.msk.bf16.vlgmr.msra.gmra.mrb[20].mxu0 %vm717_vm2, %v4509_v9 }
  0x7a   : > { %3861 = vmatmul.mubr.msk.bf16.vlgmr.msra.gmra.mrb[20].mxu1 %vm717_vm2, %v4509_v9  ;;  %3865 = vmatpush3.bf16.msra.mxu0 %v4167_v40 }
  0x7b   : > { %3875 = vmatpush3.bf16.msra.mxu1 %v4168_v41  ;;  %3866 = vmatprep.subr.bf16.mxu0 %v4324_v2 }
  0x7c   : > { %3876 = vmatprep.subr.bf16.mxu1 %v4324_v2  ;;  %3870 = vmatprep.mubr.msk.bf16.mxu0 %vm4325_vm1, %v4324_v2 }
  0x7d   : > { %3880 = vmatprep.mubr.msk.bf16.mxu1 %vm4325_vm1, %v4324_v2 }
  0x7e   : > { %3867 = vmatpush3.bf16.msra.mxu0 %v4169_v42  ;;  %v3492_v42 = vld [vmem:[%s4469_s16 + $0x3] ss:$0 sm:$0xff] }
  0x7f   : > { %3877 = vmatpush3.bf16.msra.mxu1 %v4170_v43  ;;  %3868 = vmatprep.subr.bf16.mxu0 %v4324_v2 }
  0x80   : > { %3878 = vmatprep.subr.bf16.mxu1 %v4324_v2 }
  0x82   : > { %3869 = vmatpush3.bf16.msra.mxu0 %v4171_v44 }
  0x83   : > { %3879 = vmatpush3.bf16.msra.mxu1 %v4172_v45  ;;  %3884 = vmatprep.subr.bf16.mxu0 %v4324_v2 }
  0x84   : > { %3894 = vmatprep.subr.bf16.mxu1 %v4324_v2 }
  0x85   : > { %3871 = vmatmul.mubr.msk.bf16.vlgmr.msra.gmra.mrb[24].mxu0 %vm717_vm2, %v4509_v9 }
  0x86   : > { %3881 = vmatmul.mubr.msk.bf16.vlgmr.msra.gmra.mrb[24].mxu1 %vm717_vm2, %v4509_v9  ;;  %3885 = vmatpush3.bf16.msra.mxu0 %v4173_v46 }
  0x87   : > { %3895 = vmatpush3.bf16.msra.mxu1 %v4174_v47  ;;  %3886 = vmatprep.subr.bf16.mxu0 %v4324_v2 }
  0x88   : > { %3896 = vmatprep.subr.bf16.mxu1 %v4324_v2  ;;  %3890 = vmatprep.mubr.msk.bf16.mxu0 %vm4325_vm1, %v4324_v2 }
  0x89   : > { %3900 = vmatprep.mubr.msk.bf16.mxu1 %vm4325_vm1, %v4324_v2 }
  0x8a   : > { %3887 = vmatpush3.bf16.msra.mxu0 %v4175_v48 }
  0x8b   : > { %3897 = vmatpush3.bf16.msra.mxu1 %v4176_v49  ;;  %3888 = vmatprep.subr.bf16.mxu0 %v4324_v2 }
  0x8c   : > { %3898 = vmatprep.subr.bf16.mxu1 %v4324_v2 }
  0x8e   : > { %3889 = vmatpush3.bf16.msra.mxu0 %v4177_v50 }
  0x8f   : > { %3899 = vmatpush3.bf16.msra.mxu1 %v4178_v51  ;;  %3904 = vmatprep.subr.bf16.mxu0 %v4324_v2  ;;  %v3499_v51 = vld [vmem:[%s4469_s16 + $0xa] ss:$0 sm:$0xff] }
  0x90   : > { %3914 = vmatprep.subr.bf16.mxu1 %v4324_v2 }
  0x91   : > { %3891 = vmatmul.mubr.msk.bf16.vlgmr.msra.gmra.mrb[28].mxu0 %vm717_vm2, %v4509_v9 }
  0x92   : > { %3901 = vmatmul.mubr.msk.bf16.vlgmr.msra.gmra.mrb[28].mxu1 %vm717_vm2, %v4509_v9  ;;  %3905 = vmatpush3.bf16.msra.mxu0 %v4179_v52  ;;  %v3500_v52 = vld [vmem:[%s4469_s16 + $0xb] ss:$0 sm:$0xff] }
  0x93   : > { %3915 = vmatpush3.bf16.msra.mxu1 %v4180_v53  ;;  %3906 = vmatprep.subr.bf16.mxu0 %v4324_v2 }
  0x94   : > { %3916 = vmatprep.subr.bf16.mxu1 %v4324_v2  ;;  %3910 = vmatprep.mubr.msk.bf16.mxu0 %vm4325_vm1, %v4324_v2 }
  0x95   : > { %3920 = vmatprep.mubr.msk.bf16.mxu1 %vm4325_vm1, %v4324_v2 }
  0x96   : > { %3907 = vmatpush3.bf16.msra.mxu0 %v4181_v54  ;;  %v3493_v54 = vld [vmem:[%s4469_s16 + $0x4] ss:$0 sm:$0xff] }
  0x97   : > { %3917 = vmatpush3.bf16.msra.mxu1 %v4182_v55  ;;  %3908 = vmatprep.subr.bf16.mxu0 %v4324_v2 }
  0x98   : > { %3918 = vmatprep.subr.bf16.mxu1 %v4324_v2 }
  0x9a   : > { %3909 = vmatpush3.bf16.msra.mxu0 %v4183_v56 }
  0x9b   : > { %3919 = vmatpush3.bf16.msra.mxu1 %v4184_v57  ;;  %3924 = vmatprep.subr.mxu0 %v4324_v2 }
  0x9c   : > { %3929 = vmatprep.subr.mxu1 %v4324_v2 }
  0x9d   : > { %3911 = vmatmul.mubr.msk.bf16.vlgmr.msra.gmra.mrb[32].mxu0 %vm717_vm2, %v4509_v9 }
  0x9e   : > { %3921 = vmatmul.mubr.msk.bf16.vlgmr.msra.gmra.mrb[32].mxu1 %vm717_vm2, %v4509_v9  ;;  %3926 = vmatprep.mubr.msk.f32.mxu0 %vm4325_vm1, %v4324_v2 }
  0x9f   : > { %3931 = vmatprep.mubr.msk.f32.mxu1 %vm4325_vm1, %v4324_v2 }
 0x110   : > { %v755_v58 = vpop.f32.mrb[0].mxu0 }
 0x111   : > { %v813_v59 = vpop.f32.mrb[0].mxu1  ;;  %v3752_v60 = vpop.f32.mrb[1].mxu0  ;;  %v756_v32 = vadd.f32 %v3489_v22, %v755_v58  ;;  %v3494_v58 = vld [vmem:[%s4469_s16 + $0x5] ss:$0 sm:$0xff] }
 0x112   : > { %v3762_v61 = vpop.f32.mrb[1].mxu1  ;;  %v758_v62 = vpop.f32.mrb[2].mxu0  ;;  %v814_v34 = vadd.f32 %v3490_v26, %v813_v59 }
 0x113   : > { %v816_v63 = vpop.f32.mrb[2].mxu1  ;;  %v3753_v0 = vpop.f32.mrb[3].mxu0 }
 0x114   : > { %v3763_v1 = vpop.f32.mrb[3].mxu1 }
 0x11c   : > { %v871_v3 = vpop.f32.mrb[4].mxu0 }
 0x11d   : > { %v929_v4 = vpop.f32.mrb[4].mxu1  ;;  %v3772_v5 = vpop.f32.mrb[5].mxu0  ;;  %v872_v48 = vadd.f32 %v3491_v38, %v871_v3 }
 0x11e   : > { %v3782_v6 = vpop.f32.mrb[5].mxu1  ;;  %v874_v7 = vpop.f32.mrb[6].mxu0  ;;  %v930_v50 = vadd.f32 %v3492_v42, %v929_v4  ;;  %v3501_v4 = vld [vmem:[%s4469_s16 + $0xc] ss:$0 sm:$0xff]  ;;  %v3502_v5 = vld [vmem:[%s4469_s16 + $0xd] ss:$0 sm:$0xff] }
 0x11f   : > { %v932_v8 = vpop.f32.mrb[6].mxu1  ;;  %v3773_v9 = vpop.f32.mrb[7].mxu0 }
 0x120   : > { %v3783_v10 = vpop.f32.mrb[7].mxu1 }
 0x128   : > { %v4681_v11 = vpop.f32.mrb[8].mxu0 }
 0x129   : > { %v4683_v12 = vpop.f32.mrb[8].mxu1  ;;  %v3792_v13 = vpop.f32.mrb[9].mxu0  ;;  %v988_v0 = vadd.f32 %v3493_v54, %v4681_v11 }
 0x12a   : > { %v3802_v14 = vpop.f32.mrb[9].mxu1  ;;  %v990_v15 = vpop.f32.mrb[10].mxu0  ;;  %v1046_v3 = vadd.f32 %v3494_v58, %v4683_v12 }
 0x12b   : > { %v1048_v16 = vpop.f32.mrb[10].mxu1  ;;  %v3793_v17 = vpop.f32.mrb[11].mxu0 }
 0x12c   : > { %v3803_v18 = vpop.f32.mrb[11].mxu1 }
 0x134   : > { %v1103_v21 = vpop.f32.mrb[12].mxu0 }
 0x135   : > { %v1104_v23 = vadd.f32 %v3495_v19, %v1103_v21  ;;  %v1161_v24 = vpop.f32.mrb[12].mxu1  ;;  %v3812_v25 = vpop.f32.mrb[13].mxu0 }
 0x136   : > { %v1162_v27 = vadd.f32 %v3496_v20, %v1161_v24  ;;  %v3822_v28 = vpop.f32.mrb[13].mxu1  ;;  %v1106_v29 = vpop.f32.mrb[14].mxu0 }
 0x137   : > { %v1164_v30 = vpop.f32.mrb[14].mxu1  ;;  %v3813_v31 = vpop.f32.mrb[15].mxu0  ;;  %3925 = vmatpush3.xpose.msk.msra.mxu0 %vm1753_vm3, %v1104_v23 }
 0x138   : > { %v3823_v33 = vpop.f32.mrb[15].mxu1  ;;  %3930 = vmatpush3.xpose.msk.msra.mxu1 %vm1753_vm3, %v1162_v27  ;;  %3934 = vmatprep.subr.mxu0 %v4324_v2 }
 0x139   : > { %3939 = vmatprep.subr.mxu1 %v4324_v2 }
 0x13a   : > { %3927 = vmatmul.mubr.msk.f32.vlgmr.msra.gmra.mrb[36].mxu0 %vm1753_vm3, %v756_v32  ;;  %v1747_v32 = vlaneseq }
 0x13b   : > { %3932 = vmatmul.mubr.msk.f32.vlgmr.msra.gmra.mrb[36].mxu1 %vm1753_vm3, %v814_v34  ;;  %3936 = vmatprep.mubr.msk.f32.mxu0 %vm4325_vm1, %v4324_v2 }
 0x13c   : > { %3941 = vmatprep.mubr.msk.f32.mxu1 %vm4325_vm1, %v4324_v2  ;;  %v4741_v33 = vshrl.u32 %v1747_v32, 7  ;;  %v1750_v34 = vand.u32 127, %v1747_v32 }
 0x13e   : > { %vm1751_vm4 = vcmp.le.s32.totalorder %v1750_v34, %v4741_v33 }
 0x140   : > { %v1219_v37 = vpop.f32.mrb[16].mxu0 }
 0x141   : > { %v1220_v39 = vadd.f32 %v3497_v35, %v1219_v37  ;;  %v1277_v40 = vpop.f32.mrb[16].mxu1  ;;  %v3832_v41 = vpop.f32.mrb[17].mxu0  ;;  %v4326_v35 = vmov -1e+20  }
 0x142   : > { %v1278_v43 = vadd.f32 %v3498_v36, %v1277_v40  ;;  %v3842_v44 = vpop.f32.mrb[17].mxu1  ;;  %v1222_v45 = vpop.f32.mrb[18].mxu0  ;;  %v1752_v36 = vsel %vm1751_vm4, 0.0, %v4326_v35 }
 0x143   : > { %v1280_v46 = vpop.f32.mrb[18].mxu1  ;;  %v3833_v47 = vpop.f32.mrb[19].mxu0  ;;  %3935 = vmatpush3.xpose.msk.msra.mxu0 %vm1753_vm3, %v1220_v39 }
 0x144   : > { %v3843_v49 = vpop.f32.mrb[19].mxu1  ;;  %3940 = vmatpush3.xpose.msk.msra.mxu1 %vm1753_vm3, %v1278_v43  ;;  %3944 = vmatprep.subr.mxu0 %v4324_v2 }
 0x145   : > { %3949 = vmatprep.subr.mxu1 %v4324_v2 }
 0x146   : > { %3937 = vmatmul.mubr.msk.f32.vlgmr.msra.gmra.mrb[38].mxu0 %vm1753_vm3, %v872_v48 }
 0x147   : > { %3942 = vmatmul.mubr.msk.f32.vlgmr.msra.gmra.mrb[38].mxu1 %vm1753_vm3, %v930_v50  ;;  %3946 = vmatprep.mubr.msk.f32.mxu0 %vm4325_vm1, %v4324_v2 }
 0x148   : > { %3951 = vmatprep.mubr.msk.f32.mxu1 %vm4325_vm1, %v4324_v2 }
 0x14c   : > { %v1335_v53 = vpop.f32.mrb[20].mxu0 }
 0x14d   : > { %v1336_v55 = vadd.f32 %v3499_v51, %v1335_v53  ;;  %v1393_v56 = vpop.f32.mrb[20].mxu1  ;;  %v3852_v57 = vpop.f32.mrb[21].mxu0 }
 0x14e   : > { %v1394_v59 = vadd.f32 %v3500_v52, %v1393_v56  ;;  %v3862_v60 = vpop.f32.mrb[21].mxu1  ;;  %v1338_v61 = vpop.f32.mrb[22].mxu0 }
 0x14f   : > { %v1396_v62 = vpop.f32.mrb[22].mxu1  ;;  %v3853_v63 = vpop.f32.mrb[23].mxu0  ;;  %3945 = vmatpush3.xpose.msk.msra.mxu0 %vm1753_vm3, %v1336_v55 }
 0x150   : > { %v3863_v1 = vpop.f32.mrb[23].mxu1  ;;  %3950 = vmatpush3.xpose.msk.msra.mxu1 %vm1753_vm3, %v1394_v59  ;;  %3954 = vmatprep.subr.mxu0 %v4324_v2 }
 0x151   : > { %3959 = vmatprep.subr.mxu1 %v4324_v2 }
 0x152   : > { %3947 = vmatmul.mubr.msk.f32.vlgmr.msra.gmra.mrb[40].mxu0 %vm1753_vm3, %v988_v0 }
 0x153   : > { %3952 = vmatmul.mubr.msk.f32.vlgmr.msra.gmra.mrb[40].mxu1 %vm1753_vm3, %v1046_v3  ;;  %3956 = vmatprep.mubr.msk.f32.mxu0 %vm4325_vm1, %v4324_v2 }
 0x154   : > { %3961 = vmatprep.mubr.msk.f32.mxu1 %vm4325_vm1, %v4324_v2 }
 0x158   : > { %v1451_v6 = vpop.f32.mrb[24].mxu0 }
 0x159   : > { %v1509_v7 = vpop.f32.mrb[24].mxu1  ;;  %v1452_v8 = vadd.f32 %v3501_v4, %v1451_v6  ;;  %v3872_v9 = vpop.f32.mrb[25].mxu0 }
 0x15a   : > { %v1510_v10 = vadd.f32 %v3502_v5, %v1509_v7  ;;  %v3882_v11 = vpop.f32.mrb[25].mxu1  ;;  %v1454_v12 = vpop.f32.mrb[26].mxu0 }
 0x15b   : > { %v1512_v13 = vpop.f32.mrb[26].mxu1  ;;  %v3873_v14 = vpop.f32.mrb[27].mxu0  ;;  %3955 = vmatpush3.msra.mxu0 %v1452_v8 }
 0x15c   : > { %v3883_v15 = vpop.f32.mrb[27].mxu1  ;;  %3960 = vmatpush3.msra.mxu1 %v1510_v10  ;;  %3964 = vmatprep.subr.mxu0 %v4324_v2 }
 0x15d   : > { %3969 = vmatprep.subr.mxu1 %v4324_v2 }
 0x164   : > { %v4733_v16 = vpop.f32.mrb[28].mxu0 }
 0x165   : > { %v4735_v17 = vpop.f32.mrb[28].mxu1  ;;  %v3892_v18 = vpop.f32.mrb[29].mxu0 }
 0x166   : > { %v3902_v19 = vpop.f32.mrb[29].mxu1  ;;  %v1570_v20 = vpop.f32.mrb[30].mxu0 }
 0x167   : > { %v1628_v21 = vpop.f32.mrb[30].mxu1  ;;  %v3893_v22 = vpop.f32.mrb[31].mxu0 }
 0x168   : > { %v3903_v23 = vpop.f32.mrb[31].mxu1 }
 0x170   : > { %v4737_v24 = vpop.f32.mrb[32].mxu0 }
 0x171   : > { %v4739_v25 = vpop.f32.mrb[32].mxu1  ;;  %v3912_v26 = vpop.f32.mrb[33].mxu0 }
 0x172   : > { %v3922_v27 = vpop.f32.mrb[33].mxu1  ;;  %v1686_v28 = vpop.f32.mrb[34].mxu0 }
 0x173   : > { %v1744_v29 = vpop.f32.mrb[34].mxu1  ;;  %v3913_v30 = vpop.f32.mrb[35].mxu0 }
 0x174   : > { %v3923_v31 = vpop.f32.mrb[35].mxu1 }
 0x20d   : > { %v1826_v37 = vpop.f32.mrb[36].mxu0 }
 0x20e   : > { %v1827_v38 = vadd.f32 %v1826_v37, %v1752_v36  ;;  %v1902_v39 = vpop.f32.mrb[36].mxu1  ;;  %v3928_v40 = vpop.f32.mrb[37].mxu0 }
 0x20f   : > { %v1903_v41 = vadd.f32 %v1902_v39, %v1752_v36  ;;  %v3933_v42 = vpop.f32.mrb[37].mxu1 }
 0x210   : > { %v2210_v43 = vmul.f32 0.35355338, %v1827_v38 }
 0x211   : > { %v2211_v44 = vmul.f32 0.35355338, %v1903_v41  ;;  %v3503_v41 = vld [vmem:[%s4469_s16 + $0xe] ss:$0 sm:$0xff] }
 0x212   : > { %v2216_v45 = vsel %vm1753_vm3, %v2210_v43, -inf }
 0x213   : > { %2217 = vmax.xlane.f32.xlu0 %v2216_v45  ;;  %v2219_v46 = vsel %vm1753_vm3, %v2211_v44, -inf  ;;  %v1568_v45 = vadd.f32 %v3503_v41, %v4733_v16  ;;  %v3505_v16 = vld [vmem:[%s4469_s16 + $0x10] ss:$0 sm:$0xff] }
 0x217   : > { %2220 = vmax.xlane.f32.xlu0 %v2219_v46  ;;  %v3504_v46 = vld [vmem:[%s4469_s16 + $0xf] ss:$0 sm:$0xff] }
 0x219   : > { %v1978_v47 = vpop.f32.mrb[38].mxu0 }
 0x21a   : > { %v1979_v48 = vadd.f32 %v1978_v47, %v1752_v36  ;;  %v2054_v49 = vpop.f32.mrb[38].mxu1  ;;  %v3938_v50 = vpop.f32.mrb[39].mxu0 }
 0x21b   : > { %v2055_v51 = vadd.f32 %v2054_v49, %v1752_v36  ;;  %v3943_v52 = vpop.f32.mrb[39].mxu1  ;;  %v1626_v50 = vadd.f32 %v3504_v46, %v4735_v17 }
 0x21c   : > { %v2212_v53 = vmul.f32 0.35355338, %v1979_v48 }
 0x21d   : > { %v2213_v54 = vmul.f32 0.35355338, %v2055_v51 }
 0x21e   : > { %v2222_v55 = vsel %vm1753_vm3, %v2212_v53, -inf }
 0x21f   : > { %2223 = vmax.xlane.f32.xlu1 %v2222_v55  ;;  %v2225_v56 = vsel %vm1753_vm3, %v2213_v54, -inf }
 0x223   : > { %2226 = vmax.xlane.f32.xlu1 %v2225_v56  ;;  %v3506_v56 = vld [vmem:[%s4469_s16 + $0x11] ss:$0 sm:$0xff] }
 0x225   : > { %v2130_v57 = vpop.f32.mrb[40].mxu0 }
 0x226   : > { %v2131_v58 = vadd.f32 %v2130_v57, %v1752_v36  ;;  %v2206_v59 = vpop.f32.mrb[40].mxu1  ;;  %v3948_v60 = vpop.f32.mrb[41].mxu0 }
 0x227   : > { %v2207_v61 = vadd.f32 %v2206_v59, %v1752_v36  ;;  %v3953_v62 = vpop.f32.mrb[41].mxu1 }
 0x228   : > { %v2214_v63 = vmul.f32 0.35355338, %v2131_v58  ;;  %v1742_v58 = vadd.f32 %v3506_v56, %v4739_v25  ;;  %v2726_v25 = vld [vmem:[%s4479_s23] sm:$0xf] }
 0x229   : > { %v2215_v0 = vmul.f32 0.35355338, %v2207_v61  ;;  %v2737_v62 = vsel %vm2735_vm5, %v2726_v25, 0  ;;  %v4828_v56 = vld [vmem:[%s4489_s19] sm:$0xff] }
 0x22a   : > { %v2228_v1 = vsel %vm1753_vm3, %v2214_v63, -inf }
 0x22b   : > { %v2231_v3 = vsel %vm1753_vm3, %v2215_v0, -inf  ;;  %2229 = vmax.xlane.f32.xlu0 %v2228_v1  ;;  %v2728_v1 = vld [vmem:[%s4479_s23 + $0x8] sm:$0xf] }
 0x22c   : > { %2232 = vmax.xlane.f32.xlu1 %v2231_v3 }
 0x2a0   : > { %v2218_v4 = vpop.xlane.xlu0 %2217 }
 0x2a1   : > { %v2234_v5 = vsub.f32 %v2210_v43, %v2218_v4 }
 0x2a3   : > { %v2240_v6 = vmul.f32 1.442695, %v2234_v5 }
 0x2a4   : > { %v2221_v7 = vpop.xlane.xlu0 %2220 }
 0x2a5   : > { %4192 = vpow2.f32 %v2240_v6  ;;  %v2235_v8 = vsub.f32 %v2211_v44, %v2221_v7  ;;  %v2829_v6 = vsel %vm2735_vm5, %v2728_v1, 0  ;;  %v2729_v7 = vld [vmem:[%s4479_s23 + $0xc] sm:$0xf] }
 0x2a7   : > { %v2242_v9 = vmul.f32 1.442695, %v2235_v8 }
 0x2a9   : > { %4194 = vpow2.f32 %v2242_v9 }
 0x2ac   : > { %v2224_v10 = vpop.xlane.xlu1 %2223 }
 0x2ad   : > { %v2236_v11 = vsub.f32 %v2212_v53, %v2224_v10 }
 0x2af   : > { %v4193_v12 = vpop.eup %4192  ;;  %v2244_v13 = vmul.f32 1.442695, %v2236_v11  ;;  %v2875_v11 = vsel %vm2735_vm5, %v2729_v7, 0 }
 0x2b0   : > { %v2227_v14 = vpop.xlane.xlu1 %2226  ;;  %v2252_v15 = vsel %vm1753_vm3, %v4193_v12, 0.0 }
 0x2b1   : > { %4196 = vpow2.f32 %v2244_v13  ;;  %v2237_v18 = vsub.f32 %v2213_v54, %v2227_v14  ;;  %2253 = vadd.xlane.f32.xlu0 %v2252_v15  ;;  %v1684_v54 = vadd.f32 %v3505_v16, %v4737_v24 }
 0x2b3   : > { %v4195_v19 = vpop.eup %4194  ;;  %v2246_v20 = vmul.f32 1.442695, %v2237_v18 }
 0x2b4   : > { %v2255_v21 = vsel %vm1753_vm3, %v4195_v19, 0.0 }
 0x2b5   : > { %4198 = vpow2.f32 %v2246_v20  ;;  %2256 = vadd.xlane.f32.xlu1 %v2255_v21 }
 0x2b8   : > { %v2230_v22 = vpop.xlane.xlu0 %2229 }
 0x2b9   : > { %v2233_v23 = vpop.xlane.xlu1 %2232  ;;  %v2238_v26 = vsub.f32 %v2214_v63, %v2230_v22  ;;  %v2727_v63 = vld [vmem:[%s4479_s23 + $0x4] sm:$0xf] }
 0x2ba   : > { %v2239_v27 = vsub.f32 %v2215_v0, %v2233_v23  ;;  %v2783_v0 = vsel %vm2735_vm5, %v2727_v63, 0 }
 0x2bb   : > { %v4197_v28 = vpop.eup %4196  ;;  %v2248_v29 = vmul.f32 1.442695, %v2238_v26 }
 0x2bc   : > { %v2250_v30 = vmul.f32 1.442695, %v2239_v27  ;;  %v2258_v31 = vsel %vm1753_vm3, %v4197_v28, 0.0 }
 0x2bd   : > { %4200 = vpow2.f32 %v2248_v29  ;;  %2259 = vadd.xlane.f32.xlu0 %v2258_v31 }
 0x2be   : > { %4202 = vpow2.f32 %v2250_v30 }
 0x2bf   : > { %v4199_v32 = vpop.eup %4198 }
 0x2c0   : > { %v2261_v34 = vsel %vm1753_vm3, %v4199_v32, 0.0 }
 0x2c1   : > { %2262 = vadd.xlane.f32.xlu1 %v2261_v34 }
 0x2c7   : > { %v4201_v35 = vpop.eup %4200 }
 0x2c8   : > { %v4203_v36 = vpop.eup %4202  ;;  %v2264_v37 = vsel %vm1753_vm3, %v4201_v35, 0.0 }
 0x2c9   : > { %v2267_v38 = vsel %vm1753_vm3, %v4203_v36, 0.0  ;;  %2265 = vadd.xlane.f32.xlu0 %v2264_v37 }
 0x2ca   : > { %2268 = vadd.xlane.f32.xlu1 %v2267_v38 }
 0x33e   : > { %v2254_v39 = vpop.xlane.xlu0 %2253 }
 0x33f   : > { %4204 = vrcp.f32 %v2254_v39 }
 0x342   : > { %v2257_v40 = vpop.xlane.xlu1 %2256 }
 0x343   : > { %4206 = vrcp.f32 %v2257_v40 }
 0x349   : > { %v4205_v42 = vpop.eup %4204 }
 0x34a   : > { %v2276_v43 = vmul.f32 %v4205_v42, %v4193_v12  ;;  %v2260_v44 = vpop.xlane.xlu0 %2259  ;;  %v2730_v12 = vld [vmem:[%s4479_s23 + $0x10] sm:$0xf] }
 0x34b   : > { %4208 = vrcp.f32 %v2260_v44  ;;  %v2921_v18 = vsel %vm2735_vm5, %v2730_v12, 0 }
 0x34c   : > { %3957 = vmatmul.mubr.msk.f32.vlgmr.msra.gmra.mrb[42].mxu0 %vm1753_vm3, %v2276_v43 }
 0x34d   : > { %v4207_v47 = vpop.eup %4206  ;;  %3965 = vmatpush3.msra.mxu0 %v1568_v45  ;;  %3966 = vmatprep.mubr.msk.f32.mxu0 %vm4325_vm1, %v4324_v2 }
 0x34e   : > { %v2277_v48 = vmul.f32 %v4207_v47, %v4195_v19  ;;  %v2263_v49 = vpop.xlane.xlu1 %2262  ;;  %3974 = vmatprep.subr.mxu0 %v4324_v2  ;;  %v2731_v19 = vld [vmem:[%s4479_s23 + $0x14] sm:$0xf] }
 0x34f   : > { %4210 = vrcp.f32 %v2263_v49  ;;  %v2967_v23 = vsel %vm2735_vm5, %v2731_v19, 0  ;;  %v4189_v19 = vld [vmem:[%s4474_s21 + $0x8] sm:$0xff]  }
 0x350   : > { %3962 = vmatmul.mubr.msk.f32.vlgmr.msra.gmra.mrb[42].mxu1 %vm1753_vm3, %v2277_v48 }
 0x351   : > { %3970 = vmatpush3.msra.mxu1 %v1626_v50  ;;  %3971 = vmatprep.mubr.msk.f32.mxu1 %vm4325_vm1, %v4324_v2 }
 0x352   : > { %3979 = vmatprep.subr.mxu1 %v4324_v2 }
 0x355   : > { %v4209_v51 = vpop.eup %4208 }
 0x356   : > { %v2278_v52 = vmul.f32 %v4209_v51, %v4197_v28  ;;  %v2266_v53 = vpop.xlane.xlu0 %2265 }
 0x357   : > { %v2269_v55 = vpop.xlane.xlu1 %2268  ;;  %4212 = vrcp.f32 %v2266_v53 }
 0x358   : > { %4214 = vrcp.f32 %v2269_v55  ;;  %3967 = vmatmul.mubr.msk.f32.vlgmr.msra.gmra.mrb[44].mxu0 %vm1753_vm3, %v2278_v52  ;;  %v3022_v55 = vsub.s32 0, %v4741_v33 }
 0x359   : > { %v4211_v17 = vpop.eup %4210  ;;  %3975 = vmatpush3.msra.mxu0 %v1684_v54  ;;  %3976 = vmatprep.mubr.msk.f32.mxu0 %vm4325_vm1, %v4324_v2 }
 0x35a   : > { %v2279_v57 = vmul.f32 %v4211_v17, %v4199_v32  ;;  %3984 = vmatprep.subr.bf16.mxu0 %v4324_v2 }
 0x35c   : > { %3972 = vmatmul.mubr.msk.f32.vlgmr.msra.gmra.mrb[44].mxu1 %vm1753_vm3, %v2279_v57 }
 0x35d   : > { %3980 = vmatpush3.msra.mxu1 %v1742_v58  ;;  %3981 = vmatprep.mubr.msk.f32.mxu1 %vm4325_vm1, %v4324_v2 }
 0x35e   : > { %3990 = vmatprep.subr.bf16.mxu1 %v4324_v2 }
 0x361   : > { %v4213_v24 = vpop.eup %4212 }
 0x362   : > { %v4215_v59 = vpop.eup %4214  ;;  %v2280_v60 = vmul.f32 %v4213_v24, %v4201_v35 }
 0x363   : > { %v2281_v61 = vmul.f32 %v4215_v59, %v4203_v36 }
 0x364   : > { %3977 = vmatmul.mubr.msk.f32.vlgmr.msra.gmra.mrb[46].mxu0 %vm1753_vm3, %v2280_v60  ;;  %v3023_v60 = vrot.slane %v4828_v56, %v3022_v55 }
 0x365   : > { %3982 = vmatmul.mubr.msk.f32.vlgmr.msra.gmra.mrb[46].mxu1 %vm1753_vm3, %v2281_v61  ;;  %3986 = vmatprep.mubr.msk.bf16.mxu0 %vm4325_vm1, %v4324_v2 }
 0x366   : > { %3992 = vmatprep.mubr.msk.bf16.mxu1 %vm4325_vm1, %v4324_v2  ;;  %3985 = vmatpush3.bf16.msra.mxu0 %v2737_v62 }
 0x367   : > { %3996 = vmatprep.subr.bf16.mxu0 %v4324_v2  ;;  %3991 = vmatpush3.bf16.msra.mxu1 %v2783_v0 }
 0x368   : > { %4002 = vmatprep.subr.bf16.mxu1 %v4324_v2 }
 0x41f   : > { %v2351_v3 = vpop.f32.mrb[42].mxu0 }
 0x420   : > { %v2720_v4 = vpack.c.bf16 %v2351_v3, %v2351_v3  ;;  %v3958_v5 = vpop.f32.mrb[43].mxu0 }
 0x421   : > { %v4220_v5 = vld [vmem:[#allocation2] sm:$0xff] }
 0x422   : > { %3987 = vmatmul.mubr.msk.bf16.vlgmr.msra.gmra.mrb[48].mxu0 %vm1753_vm3, %v2720_v4 }
 0x423   : > { %v2424_v8 = vpop.f32.mrb[42].mxu1  ;;  %3997 = vmatpush3.bf16.msra.mxu0 %v2829_v6  ;;  %3998 = vmatprep.mubr.msk.bf16.mxu0 %vm4325_vm1, %v4324_v2 }
 0x424   : > { %v2721_v9 = vpack.c.bf16 %v2424_v8, %v2424_v8  ;;  %v3963_v10 = vpop.f32.mrb[43].mxu1  ;;  %4008 = vmatprep.subr.bf16.mxu0 %v4324_v2 }
 0x426   : > { %3993 = vmatmul.mubr.msk.bf16.vlgmr.msra.gmra.mrb[48].mxu1 %vm1753_vm3, %v2721_v9 }
 0x427   : > { %4003 = vmatpush3.bf16.msra.mxu1 %v2875_v11  ;;  %4004 = vmatprep.mubr.msk.bf16.mxu1 %vm4325_vm1, %v4324_v2 }
 0x428   : > { %4014 = vmatprep.subr.bf16.mxu1 %v4324_v2 }
 0x42b   : > { %v2497_v13 = vpop.f32.mrb[44].mxu0 }
 0x42c   : > { %v2722_v14 = vpack.c.bf16 %v2497_v13, %v2497_v13  ;;  %v3968_v15 = vpop.f32.mrb[45].mxu0  ;;  %v4185_v13 = vld [vmem:[%s4484_s20] sm:$0xff]  }
 0x42d   : > { %v4187_v15 = vld [vmem:[%s4484_s20 + $0x10] sm:$0xff]  }
 0x42e   : > { %3999 = vmatmul.mubr.msk.bf16.vlgmr.msra.gmra.mrb[52].mxu0 %vm1753_vm3, %v2722_v14  ;;  %v4186_v14 = vld [vmem:[%s4484_s20 + $0x8] sm:$0xff]  }
 0x42f   : > { %v2570_v20 = vpop.f32.mrb[44].mxu1  ;;  %4009 = vmatpush3.bf16.msra.mxu0 %v2921_v18  ;;  %4010 = vmatprep.mubr.msk.bf16.mxu0 %vm4325_vm1, %v4324_v2  ;;  %v4188_v18 = vld [vmem:[%s4474_s21] sm:$0xff]  }
 0x430   : > { %v2723_v21 = vpack.c.bf16 %v2570_v20, %v2570_v20  ;;  %v3973_v22 = vpop.f32.mrb[45].mxu1  ;;  %4020 = vmatprep.subr.bf16.mxu0 %v4324_v2 }
 0x432   : > { %4005 = vmatmul.mubr.msk.bf16.vlgmr.msra.gmra.mrb[52].mxu1 %vm1753_vm3, %v2723_v21 }
 0x433   : > { %4015 = vmatpush3.bf16.msra.mxu1 %v2967_v23  ;;  %4016 = vmatprep.mubr.msk.bf16.mxu1 %vm4325_vm1, %v4324_v2  ;;  %v3042_v23 = vsub.s32 1, %v4741_v33 }
 0x434   : > { %4030 = vmatprep.subr.bf16.mxu1 %v4324_v2 }
 0x437   : > { %v2643_v26 = vpop.f32.mrb[46].mxu0 }
 0x438   : > { %v2724_v27 = vpack.c.bf16 %v2643_v26, %v2643_v26  ;;  %v2716_v28 = vpop.f32.mrb[46].mxu1  ;;  %v3978_v29 = vpop.f32.mrb[47].mxu0  ;;  %v3047_v26 = vsub.s32 2, %v4741_v33 }
 0x439   : > { %v2725_v30 = vpack.c.bf16 %v2716_v28, %v2716_v28  ;;  %v3983_v31 = vpop.f32.mrb[47].mxu1 }
 0x43a   : > { %4011 = vmatmul.mubr.msk.bf16.vlgmr.msra.gmra.mrb[56].mxu0 %vm1753_vm3, %v2724_v27  ;;  %v3043_v27 = vrot.slane %v4828_v56, %v3042_v23 }
 0x43b   : > { %4017 = vmatmul.mubr.msk.bf16.vlgmr.msra.gmra.mrb[56].mxu1 %vm1753_vm3, %v2725_v30  ;;  %4026 = vmatprep.mubr.msk.bf16.mxu0 %vm4325_vm1, %v4324_v2  ;;  %v3048_v30 = vrot.slane %v4828_v56, %v3047_v26 }
 0x43c   : > { %4038 = vmatprep.mubr.msk.bf16.mxu1 %vm4325_vm1, %v4324_v2  ;;  %4021 = vmatpush3.bf16.msra.mxu0 %v4185_v13 }
 0x43d   : > { %4022 = vmatprep.subr.bf16.mxu0 %v4324_v2  ;;  %4031 = vmatpush3.bf16.msra.mxu1 %v4188_v18 }
 0x43e   : > { %4032 = vmatprep.subr.bf16.mxu1 %v4324_v2 }
 0x440   : > { %4023 = vmatpush3.bf16.msra.mxu0 %v4186_v14 }
 0x441   : > { %4024 = vmatprep.subr.bf16.mxu0 %v4324_v2  ;;  %4033 = vmatpush3.bf16.msra.mxu1 %v4189_v19 }
 0x442   : > { %4034 = vmatprep.subr.bf16.mxu1 %v4324_v2 }
 0x444   : > { %4025 = vmatpush3.bf16.msra.mxu0 %v4187_v15 }
 0x4f5   : > { %v2773_v32 = vpop.f32.mrb[48].mxu0 }
 0x4f6   : > { %v3988_v34 = vpop.f32.mrb[49].mxu0  ;;  %v3009_v38 = vsel %vm717_vm2, %v2773_v32, 0.0 }
 0x4f7   : > { %v2776_v35 = vpop.f32.mrb[50].mxu0 }
 0x4f8   : > { %v3989_v36 = vpop.f32.mrb[51].mxu0  ;;  %v4190_v35 = vld [vmem:[%s4474_s21 + $0x10] sm:$0xff]  }
 0x4f9   : > { %v2819_v37 = vpop.f32.mrb[48].mxu1  ;;  %4035 = vmatpush3.bf16.msra.mxu1 %v4190_v35  ;;  %v4191_v36 = vld [vmem:[%s4474_s21 + $0x18] sm:$0xff]  }
 0x4fa   : > { %v3010_v39 = vsel %vm717_vm2, %v2819_v37, 0.0  ;;  %v3994_v40 = vpop.f32.mrb[49].mxu1  ;;  %4036 = vmatprep.subr.bf16.mxu1 %v4324_v2  ;;  %v3059_v37 = vsub.s32 3, %v4741_v33 }
 0x4fb   : > { %v3011_v41 = vadd.f32 %v3010_v39, %v3009_v38  ;;  %v2822_v42 = vpop.f32.mrb[50].mxu1 }
 0x4fc   : > { %v3995_v43 = vpop.f32.mrb[51].mxu1  ;;  %v3060_v38 = vrot.slane %v4828_v56, %v3059_v37 }
 0x4fd   : > { %4037 = vmatpush3.bf16.msra.mxu1 %v4191_v36 }
 0x501   : > { %v2865_v44 = vpop.f32.mrb[52].mxu0 }
 0x502   : > { %v3012_v45 = vsel %vm717_vm2, %v2865_v44, 0.0  ;;  %v4000_v46 = vpop.f32.mrb[53].mxu0 }
 0x503   : > { %v3013_v47 = vadd.f32 %v3012_v45, %v3011_v41  ;;  %v2868_v48 = vpop.f32.mrb[54].mxu0  ;;  %v3134_v46 = vsub.s32 4, %v4741_v33 }
 0x504   : > { %v4001_v49 = vpop.f32.mrb[55].mxu0 }
 0x505   : > { %v2911_v50 = vpop.f32.mrb[52].mxu1 }
 0x506   : > { %v3014_v16 = vsel %vm717_vm2, %v2911_v50, 0.0  ;;  %v4006_v51 = vpop.f32.mrb[53].mxu1 }
 0x507   : > { %v3015_v52 = vadd.f32 %v3014_v16, %v3013_v47  ;;  %v2914_v53 = vpop.f32.mrb[54].mxu1  ;;  %v3135_v47 = vrot.slane %v4828_v56, %v3134_v46 }
 0x508   : > { %v4007_v54 = vpop.f32.mrb[55].mxu1 }
 0x50d   : > { %v2957_v17 = vpop.f32.mrb[56].mxu0 }
 0x50e   : > { %v3016_v57 = vsel %vm717_vm2, %v2957_v17, 0.0  ;;  %v3003_v58 = vpop.f32.mrb[56].mxu1  ;;  %v4012_v24 = vpop.f32.mrb[57].mxu0 }
 0x50f   : > { %v3017_v59 = vadd.f32 %v3016_v57, %v3015_v52  ;;  %v4018_v61 = vpop.f32.mrb[57].mxu1  ;;  %v2960_v25 = vpop.f32.mrb[58].mxu0  ;;  %v3018_v62 = vsel %vm717_vm2, %v3003_v58, 0.0 }
 0x510   : > { %v3006_v63 = vpop.f32.mrb[58].mxu1  ;;  %v4013_v0 = vpop.f32.mrb[59].mxu0  ;;  %v3225_v61 = vsub.s32 6, %v4741_v33 }
 0x511   : > { %v3019_v1 = vadd.f32 %v3018_v62, %v3017_v59  ;;  %v4019_v3 = vpop.f32.mrb[59].mxu1 }
 0x512   : > { %v3226_v63 = vrot.slane %v4828_v56, %v3225_v61 }
 0x513   : > { %v3024_v4 = vadd.f32 %v3023_v60, %v3019_v1  ;;  %v3220_v60 = vsub.s32 5, %v4741_v33  ;;  %v4222_v33 = vld [vmem:[%s4941_s7 + $0x8] sm:$0xff] (!%p3612_p1)  }
 0x515   : > { %v3025_v6 = vadd.f32 %v4220_v5, %v3024_v4  ;;  %v3221_v25 = vrot.slane %v4828_v56, %v3220_v60  ;;  %v4221_v4 = vld [vmem:[%s4941_s7] sm:$0xff] (!%p3612_p1)   ;;  %v4327_v5 = vmov (!%p3612_p1), 0.0   ;;  %v4223_v56 = vld [vmem:[%s4941_s7 + $0x10] sm:$0xff] (!%p3612_p1)  }
 0x516   : > { %4042 = vmatprep.subr.bf16.mxu0 (!%p3612_p1), %v4327_v5 }
 0x517   : > { %v3026_v7 = vsel %vm717_vm2, %v3025_v6, 0.0 }
 0x518   : > { %3027 = vadd.xlane.f32.xlu0 %v3026_v7 }
 0x5a5   : > { %v3028_v8 = vpop.xlane.xlu0 %3027 }
 0x5a6   : > { %v3030_v9 = vmul.f32 0.020833334, %v3028_v8  ;;  %v3613_v8 = vld [vmem:[%s4942_s8] ss:$0 sm:$0xff] (!%p3612_p1) }
 0x5a8   : > { %v3031_v10 = vsub.f32 %v3025_v6, %v3030_v9 }
 0x5aa   : > { %v3032_v11 = vmul.f32 %v3031_v10, %v3031_v10 }
 0x5ac   : > { %v3033_v12 = vsel %vm717_vm2, %v3032_v11, 0.0 }
 0x5ad   : > { %3034 = vadd.xlane.f32.xlu1 %v3033_v12 }
 0x63a   : > { %v3035_v20 = vpop.xlane.xlu1 %3034 }
 0x63b   : > { %v3036_v21 = vmul.f32 0.020833334, %v3035_v20 }
 0x63d   : > { %v3037_v22 = vadd.f32 1e-05, %v3036_v21 }
 0x63f   : > { %4216 = vrsqrt.f32 %v3037_v22 }
 0x649   : > { %v4217_v28 = vpop.eup %4216 }
 0x64a   : > { %v3039_v29 = vmul.f32 %v4217_v28, %v3031_v10 }
 0x64c   : > { %v3044_v31 = vmul.f32 %v3043_v27, %v3039_v29 }
 0x64e   : > { %v3049_v32 = vadd.f32 %v3048_v30, %v3044_v31 }
 0x650   : > { %v3050_v34 = vpack.c.bf16 %v3049_v32, %v3049_v32 }
 0x652   : > { %4027 = vmatmul.mubr.msk.bf16.vlgmr.msra.gmra.mrb[60].mxu0 %vm717_vm2, %v3050_v34 }
 0x653   : > { %4043 = vmatpush3.bf16.msra.mxu0 (!%p3612_p1), %v4221_v4  ;;  %4048 = vmatprep.mubr.msk.bf16.mxu0 (!%p3612_p1), %vm4328_vm7, %v4327_v5 }
 0x654   : > { %4044 = vmatprep.subr.bf16.mxu0 (!%p3612_p1), %v4327_v5 }
 0x657   : > { %4045 = vmatpush3.bf16.msra.mxu0 (!%p3612_p1), %v4222_v33 }
 0x658   : > { %4046 = vmatprep.subr.bf16.mxu0 (!%p3612_p1), %v4327_v5 }
 0x65b   : > { %4047 = vmatpush3.bf16.msra.mxu0 (!%p3612_p1), %v4223_v56 }
 0x725   : > { %v3116_v39 = vpop.f32.mrb[60].mxu0 }
 0x726   : > { %v3117_v40 = vadd.f32 %v3116_v39, %v3060_v38  ;;  %v4028_v41 = vpop.f32.mrb[61].mxu0 }
 0x727   : > { %v3119_v42 = vpop.f32.mrb[62].mxu0 }
 0x728   : > { %v3122_v43 = vmax.f32 %v3117_v40, 0.0  ;;  %v4029_v44 = vpop.f32.mrb[63].mxu0 }
 0x72a   : > { %v3123_v45 = vpack.c.bf16 %v3122_v43, %v3122_v43 }
 0x72c   : > { %4039 = vmatmul.mubr.msk.bf16.vlgmr.msra.gmra.mrb[60].mxu1 %vm3160_vm6, %v3123_v45 }
 0x7ff   : > { %v3198_v2 = vpop.f32.mrb[60].mxu1 }
 0x800   : > { %v3199_v48 = vadd.f32 %v3198_v2, %v3135_v47  ;;  %v4040_v49 = vpop.f32.mrb[61].mxu1 }
 0x801   : > { %v3201_v50 = vpop.f32.mrb[62].mxu1 }
 0x802   : > { %v4041_v16 = vpop.f32.mrb[63].mxu1  ;;  %v3204_v51 = vadd.f32 %v3199_v48, %v3049_v32 }
 0x804   : > { %v3205_v52 = vsel %vm717_vm2, %v3204_v51, 0.0 }
 0x805   : > { %3206 = vadd.xlane.f32.xlu0 %v3205_v52 }
 0x892   : > { %v3207_v53 = vpop.xlane.xlu0 %3206 }
 0x893   : > { %v3208_v54 = vmul.f32 0.020833334, %v3207_v53 }
 0x895   : > { %v3209_v55 = vsub.f32 %v3204_v51, %v3208_v54 }
 0x897   : > { %v3210_v17 = vmul.f32 %v3209_v55, %v3209_v55 }
 0x899   : > { %v3211_v57 = vsel %vm717_vm2, %v3210_v17, 0.0 }
 0x89a   : > { %3212 = vadd.xlane.f32.xlu1 %v3211_v57 }
 0x927   : > { %v3213_v58 = vpop.xlane.xlu1 %3212 }
 0x928   : > { %v3214_v24 = vmul.f32 0.020833334, %v3213_v58 }
 0x92a   : > { %v3215_v59 = vadd.f32 1e-05, %v3214_v24 }
 0x92c   : > { %4218 = vrsqrt.f32 %v3215_v59 }
 0x936   : > { %v4219_v62 = vpop.eup %4218 }
 0x937   : > { %v3217_v0 = vmul.f32 %v4219_v62, %v3209_v55  ;;  %3232 = sbr.rel (%p3612_p1) target bundleno = 2902 (0xb56), region = 64 }
 0x939   : > { %v3222_v1 = vmul.f32 %v3221_v25, %v3217_v0 }
 0x93b   : > { %v3227_v3 = vadd.f32 %v3226_v63, %v3222_v1 }
 0x93d   : > { %3228 = vst.msk [vmem:[#allocation2] sm:$0xff] %vm717_vm2, %v3227_v3 }
 0x944   : > { %v3233_v6 = vld [vmem:[#allocation2] sm:$0xff] }
 0x945   : > { %v3234_v7 = vpack.c.bf16 %v3233_v6, %v3233_v6 }
 0x947   : > { %4049 = vmatmul.mubr.msk.bf16.vlgmr.msra.gmra.mrb[0].mxu0 %vm717_vm2, %v3234_v7 }
 0xa1a   : > { %v3303_v9 = vpop.f32.mrb[0].mxu0 }
 0xa1b   : > { %v3304_v10 = vadd.f32 %v3613_v8, %v3303_v9  ;;  %v4050_v11 = vpop.f32.mrb[1].mxu0 }
 0xa1c   : > { %v3306_v12 = vpop.f32.mrb[2].mxu0 }
 0xa1d   : > { %3309 = vmax.xlane.f32.xlu0 %v3304_v10  ;;  %v4051_v13 = vpop.f32.mrb[3].mxu0 }
 0xaaa   : > { %v3310_v14 = vpop.xlane.xlu0 %3309 }
 0xaab   : > { %v3311_v15 = vsub.f32 %v3304_v10, %v3310_v14 }
 0xaad   : > { %v3312_v18 = vmul.f32 1.442695, %v3311_v15 }
 0xaaf   : > { %4224 = vpow2.f32 %v3312_v18 }
 0xab9   : > { %v4225_v19 = vpop.eup %4224 }
 0xaba   : > { %3314 = vadd.xlane.f32.xlu0 %v4225_v19 }
 0xb47   : > { %v3315_v20 = vpop.xlane.xlu0 %3314 }
 0xb48   : > { %4226 = vrcp.f32 %v3315_v20 }
 0xb52   : > { %v4227_v21 = vpop.eup %4226 }
 0xb53   : > { %v3317_v22 = vmul.f32 %v4227_v21, %v4225_v19 }
 0xb55   : > { %3318 = vst [vmem:[%s421_s26] sm:$0xff] %v3317_v22 }
 0xb56 PF: > { %s3619_s29 = sshll.u32 %s4310_s13, 7  ;;  %s4974_s17 = sld [smem:[#allocation18_spill]] }
 0xb57   : > { %s3333_s23 = sshll.u32 %s421_s26, 4  ;;  %s4975_s14 = sand.u32 1, %s4298_s10   ;;  %s3334_s23 = int_to_ptr.vmem [resolvable:$true] %s3333_s23 }
 0xb58   : > { %s3320_s20 = scalar_lea.sflag [#allocation4], %s4975_s14  ;;  %s4228_s25 = scalar_lea.vmem %s3334_s23, 128 }
 0xb59   : > { %p4229_p2 = scmp.ne.s32.totalorder %s3334_s23, %s4228_s25  ;;  %s4329_s30 = smov [#allocation3]  }
 0xb5a   : > { %s4232_s19 = sshll.u32 %s4329_s30, 4  ;;  %s4233_s19 = int_to_ptr.vmem [resolvable:$false] %s4232_s19 }
 0xb5b   : > { %p4230_p4 = pnand %p4229_p2, %p4429_p3  ;;  %s4234_s0 = scalar_lea.vmem %s4233_s19, 256 }
 0xb5c   : > { %s4883_s18 = scalar_lea.hbm %s4974_s17, %s3619_s29  ;;  %p4235_p6 = scmp.lt.s32.totalorder %s3334_s23, %s4233_s19 }
 0xb5d   : > { %p4231_p5 = pneg %p4230_p4  ;;  %p4236_p7 = scmp.lt.s32.totalorder %s4234_s0, %s4228_s25 }
 0xb5f   : > { %p4237_p8 = por %p4236_p7, %p4235_p6 }
 0xb61   : > { %p4238_p10 = pnand %p4237_p8, %p4231_p5 }
 0xb63   : > { %4241 = shalt.err (!%p4238_p10)
}
 0xb64   : > { %s4242_s13 = scalar_lea.hbm %s4883_s18, 128  ;;  %s4246_s1 = scalar_lea.hbm %s4974_s17, 256 }
 0xb65   : > { %p4243_p11 = scmp.ne.s32.totalorder %s4883_s18, %s4242_s13  ;;  %p4247_p0 = scmp.lt.u32.totalorder %s4883_s18, %s4974_s17 }
 0xb66   : > { %p4248_p1 = scmp.lt.u32.totalorder %s4246_s1, %s4242_s13  ;;  %p4250_p4 = scmp.lt.u32.totalorder %s4242_s13, %s4883_s18 }
 0xb67   : > { %p4244_p12 = pnand %p4243_p11, %p4429_p3 }
 0xb68   : > { %p4249_p2 = por %p4248_p1, %p4247_p0 }
 0xb69   : > { %p4245_p13 = pneg %p4244_p12 }
 0xb6a   : > { %p4251_p5 = por %p4250_p4, %p4249_p2 }
 0xb6c   : > { %p4252_p6 = pnand %p4251_p5, %p4245_p13 }
 0xb6e   : > { %4255 = shalt.err (!%p4252_p6)
}
 0xb6f   : > { %4055 = dma.vmem_to_hbm [thread:$0]  (%p4429_p3), %s3334_s23, 128, %s4883_s18, %s3320_s20  }
 0xb70 PF: > { %s4976_s15 = sld [smem:[#allocation10_spill]]  ;;  %s4977_s16 = sld [smem:[#allocation6_spill]] }
 0xb76   : > { %p4061_p7 = scmp.ge.s32.totalorder %s4976_s15, 2  ;;  %s3345_s21 = sand.u32 1, %s4977_s16  }
 0xb77   : > { %s3346_s29 = scalar_lea.sflag [#allocation4], %s3345_s21 }
 0xb78   : > { %p4058_p8 = pnand %p4061_p7, %p4439_p9 }
 0xb7a   : > { %4289 = dma.done.wait (!%p4058_p8), %s3346_s29, 128  }
 0xb7b   : > { %4291 = vsyncadd (!%p4058_p8), %s3346_s29, 4294967168  ;;  %s22_s16 = sadd.s32 1, %s4976_s15   ;;  %s4979_s24 = sld [smem:[#allocation7_spill]] }
 0xb7c   : > { %p19_p10 = scmp.ge.s32.totalorder %s22_s16, 6   ;;  %s4980_s11 = sld [smem:[#allocation15_spill]] }
 0xb7d   : > { %s4981_s12 = sld [smem:[#allocation8_spill]]  ;;  %s4982_s13 = sld [smem:[#allocation9_spill]] }
 0xb7e   : > { %s4983_s14 = sld [smem:[#allocation11_spill]]  ;;  %s4984_s15 = sld [smem:[#allocation13_spill]] }
 0xb7f   : > { %s4985_s30 = smov %s4298_s10  ;;  %21 = sbr.rel (!%p19_p10) target bundleno = 9 (0x9), region = 117 }
 0xb81   : > { %s4986_s10 = smov %s4979_s24 }
 0xb86   :  { %3351 = vsyncpa [#allocation4], 1 }
 0xb87   :  { %3353 = vsyncpa [#allocation4 + $0x1], 1 }

</bundles_post_ra>
